<compile_context>
chip_gen: v7x
topology: tpu7x:2x2x1
jax: 0.10.0
libtpu: 0.0.40
codegen_flags: <defaults>
</compile_context>

<pallas_src>
import numpy as np
import jax
import jax.numpy as jnp
from jax.experimental import pallas as pl
from jax.experimental.pallas import tpu as pltpu

# ---------------- model dimensions (from the PyTorch module) ----------------
N = 2                              # batch
C_IN, H_IN, W_IN = 3, 32, 32
C1, C2 = 6, 16                     # conv output channels
KH = KW = 5                        # conv kernel
W1_OUT = W_IN - KW + 1             # 28  conv1 spatial
P1 = W1_OUT // 2                   # 14  after pool1
W2_OUT = P1 - KW + 1               # 10  conv2 spatial
P2 = W2_OUT // 2                   # 5   after pool2
F1, F2 = 120, 84
NUM_CLASSES = 10

LANE = 128                         # every slab piece / column half is padded to 128 lanes
RB = 8                             # rows per (group, batch) block: 7 valid + 1 zero pad
M1 = 4 * N * RB                    # 64  conv1 matmul M  (4 h-mod-4 groups x N x 8)
K1 = KH * LANE                     # 640 conv1 matmul K  (5 dy-slabs x 128 lanes)
M2 = 2 * N * RB                    # 32  conv2 matmul M  (2 parity groups x N x 8)


# ------------------------------ Pallas kernel -------------------------------
def cnn_cifar_kernel(lhs1_ref, w1_ref, b1_ref, w2_ref, b2_ref,
                     wf1_ref, bf1_ref, wf2_ref, bf2_ref, wf3_ref, bf3_ref,
                     out_ref):
    # lhs1_ref: (64, 640) bf16  im2col rows r = q*16 + n*8 + s  <->  conv1 row h1 = 4s+q
    # w1/w2   : (640, 256) bf16 block-Toeplitz, columns = [even-x | odd-x] 128-lane halves
    # wf*     : fc weights (in, out), fc1 rows padded to 128 per pooled-row block

    # ---------------- conv1 + ReLU + 2x2 maxpool (single matmul) ------------
    z1 = jnp.dot(lhs1_ref[...], w1_ref[...],
                 preferred_element_type=jnp.float32)                 # (64, 256)
    z1 = jnp.maximum(z1 + b1_ref[...], 0.0)
    z1 = jnp.maximum(z1[:, :LANE], z1[:, LANE:])                     # W-pool (64, 128)
    # rows grouped by (h1 mod 4): H-pool pairs groups (0,1) and (2,3)
    p1e = jnp.maximum(z1[0 * N * RB:1 * N * RB], z1[1 * N * RB:2 * N * RB])  # (16,128) pool1 even rows
    p1o = jnp.maximum(z1[2 * N * RB:3 * N * RB], z1[3 * N * RB:4 * N * RB])  # (16,128) pool1 odd rows

    # ---------------- conv2 + ReLU + 2x2 maxpool (single matmul) ------------
    zpad = jnp.zeros((RB, LANE), jnp.float32)
    p1e_x = jnp.concatenate([p1e, zpad], axis=0)                     # (24, 128)
    p1o_x = jnp.concatenate([p1o, zpad], axis=0)
    sh = lambda a, off: a[off:off + N * RB]                          # pool1 rows shifted by off
    # even conv2 rows h2 = 2t need pool1 rows 2t..2t+4, odd rows need 2t+1..2t+5;
    # all pieces are 128 lanes wide, so this concat is vreg-aligned placement only.
    slab_e = jnp.concatenate([p1e, p1o, sh(p1e_x, 1), sh(p1o_x, 1), sh(p1e_x, 2)], axis=1)
    slab_o = jnp.concatenate([p1o, sh(p1e_x, 1), sh(p1o_x, 1), sh(p1e_x, 2), sh(p1o_x, 2)], axis=1)
    lhs2 = jnp.concatenate([slab_e, slab_o], axis=0).astype(jnp.bfloat16)    # (32, 640)

    z2 = jnp.dot(lhs2, w2_ref[...], preferred_element_type=jnp.float32)      # (32, 256)
    z2 = jnp.maximum(z2 + b2_ref[...], 0.0)
    z2 = jnp.maximum(z2[:, :LANE], z2[:, LANE:])                     # W-pool (32, 128)
    pool2 = jnp.maximum(z2[:N * RB], z2[N * RB:])                    # H-pool (16, 128)
    # pool2 row n*8 + t <-> batch n, pooled row t (t < 5); lanes px*16 + c (80 valid)

    # ---------------- flatten + FC head + log_softmax -----------------------
    flat = jnp.concatenate(
        [jnp.concatenate([pool2[n * RB + t:n * RB + t + 1, :] for t in range(P2)], axis=1)
         for n in range(N)], axis=0).astype(jnp.bfloat16)            # (2, 640), 128-aligned pieces

    a1 = jnp.dot(flat, wf1_ref[...], preferred_element_type=jnp.float32) + bf1_ref[...]
    a1 = jnp.maximum(a1, 0.0)
    a2 = jnp.dot(a1.astype(jnp.bfloat16), wf2_ref[...],
                 preferred_element_type=jnp.float32) + bf2_ref[...]
    a2 = jnp.maximum(a2, 0.0)
    logits = jnp.dot(a2.astype(jnp.bfloat16), wf3_ref[...],
                     preferred_element_type=jnp.float32) + bf3_ref[...]       # (2, 10)

    s = logits - jnp.max(logits, axis=-1, keepdims=True)
    out_ref[...] = s - jnp.log(jnp.sum(jnp.exp(s), axis=-1, keepdims=True))   # one full store


# ------------------------------ wrapper helpers ------------------------------
def _conv_toeplitz(w, w_out):
    """Fold (Cout, Cin, 5, 5) conv weights into a (5*128, 256) block-Toeplitz matrix.

    Row:  dy*128 + (x + kx)*Cin + c        (matches the 128-lane dy-slab activation layout)
    Col:  (x % 2)*128 + (x // 2)*Cout + o  ([even-x | odd-x] 128-lane halves so the
                                            2x2 W-pool is a max of two aligned halves)
    Padding rows/cols stay zero.
    """
    cout, cin, kh, kw = w.shape
    dy, kx, c, x, o = np.meshgrid(np.arange(kh), np.arange(kw), np.arange(cin),
                                  np.arange(w_out), np.arange(cout), indexing="ij")
    rows = dy * LANE + (x + kx) * cin + c
    cols = (x % 2) * LANE + (x // 2) * cout + o
    vals = w[o.ravel(), c.ravel(), dy.ravel(), kx.ravel()].astype(jnp.float32)
    mat = jnp.zeros((kh * LANE, 2 * LANE), jnp.float32)
    return mat.at[rows.ravel(), cols.ravel()].set(vals)


def _conv_bias(b, w_out):
    cout = b.shape[0]
    x = np.arange(w_out)[:, None]
    o = np.arange(cout)[None, :]
    cols = ((x % 2) * LANE + (x // 2) * cout + o).ravel()
    vals = jnp.broadcast_to(b.astype(jnp.float32), (w_out, cout)).ravel()
    return jnp.zeros((1, 2 * LANE), jnp.float32).at[0, cols].set(vals)


def _conv1_im2col(x_nchw):
    """(N,3,32,32) -> (64, 640) bf16 im2col: row r = q*16 + n*8 + s <-> conv1 output row
    h1 = 4*s + q of batch n (s=7 rows zero-padded); lane = dy*128 + w*3 + c (96 valid
    lanes per 128-lane dy-slab)."""
    x = jnp.transpose(x_nchw, (0, 2, 3, 1)).reshape(N, H_IN, W_IN * C_IN)    # (N, 32, 96)
    x = jnp.pad(x, ((0, 0), (0, 0), (0, LANE - W_IN * C_IN)))                # (N, 32, 128)
    q = np.arange(4)[:, None, None]
    s = np.arange(RB)[None, :, None]
    dy = np.arange(KH)[None, None, :]
    h = np.minimum(4 * s + q + dy, H_IN - 1)                                 # (4, 8, 5)
    rows = x[:, h.reshape(-1), :].reshape(N, 4, RB, KH, LANE)
    valid = jnp.asarray(s < RB - 1)[None, :, :, :, None]                     # zero the pad rows
    rows = jnp.where(valid, rows, 0.0)
    lhs1 = jnp.transpose(rows, (1, 0, 2, 3, 4)).reshape(M1, K1)
    return lhs1.astype(jnp.bfloat16)


def _fc1_weight(wf1):
    """PyTorch fc1 (120, 400), input index c*25 + h*5 + w  ->  (640, 120) matching the
    kernel's flat layout t*128 + px*16 + c (lanes >= 80 per pooled-row block are zero)."""
    w = wf1.reshape(F1, C2, P2, P2).transpose(2, 3, 1, 0).reshape(P2, P2 * C2, F1)
    mat = jnp.zeros((P2, LANE, F1), jnp.float32).at[:, :P2 * C2, :].set(w.astype(jnp.float32))
    return mat.reshape(P2 * LANE, F1)


@jax.jit
def cnn_cifar_forward(x_nchw, params):
    w1, b1, w2, b2, wf1, bf1, wf2, bf2, wf3, bf3 = params

    # ---- wrapper-side layout plumbing (cache across calls in a real loop) ----
    lhs1 = _conv1_im2col(x_nchw)                               # (64, 640)  bf16
    w1t = _conv_toeplitz(w1, W1_OUT).astype(jnp.bfloat16)      # (640, 256) bf16
    w2t = _conv_toeplitz(w2, W2_OUT).astype(jnp.bfloat16)      # (640, 256) bf16
    b1t = _conv_bias(b1, W1_OUT)                               # (1, 256)   f32
    b2t = _conv_bias(b2, W2_OUT)                               # (1, 256)   f32
    wf1t = _fc1_weight(wf1).astype(jnp.bfloat16)               # (640, 120) bf16
    wf2t = wf2.T.astype(jnp.bfloat16)                          # (120, 84)  bf16
    wf3t = wf3.T.astype(jnp.bfloat16)                          # (84, 10)   bf16
    bf1t = bf1.reshape(1, -1).astype(jnp.float32)
    bf2t = bf2.reshape(1, -1).astype(jnp.float32)
    bf3t = bf3.reshape(1, -1).astype(jnp.float32)

    vmem = pl.BlockSpec(memory_space=pltpu.MemorySpace.VMEM)
    return pl.pallas_call(
        cnn_cifar_kernel,
        out_shape=jax.ShapeDtypeStruct((N, NUM_CLASSES), jnp.float32),
        in_specs=[vmem] * 11,
        out_specs=vmem,
    )(lhs1, w1t, b1t, w2t, b2t, wf1t, bf1t, wf2t, bf2t, wf3t, bf3t)


# ------------------------------ pure-JAX reference ---------------------------
def cnn_cifar_reference(x, params):
    """Matches the PyTorch forward exactly (f32, HIGHEST precision)."""
    w1, b1, w2, b2, wf1, bf1, wf2, bf2, wf3, bf3 = params
    dn = ("NCHW", "OIHW", "NCHW")
    hp = jax.lax.Precision.HIGHEST

    z = jax.lax.conv_general_dilated(x, w1, (1, 1), "VALID",
                                     dimension_numbers=dn, precision=hp)
    z = jnp.maximum(z + b1[None, :, None, None], 0.0)
    z = jax.lax.reduce_window(z, -jnp.inf, jax.lax.max, (1, 1, 2, 2), (1, 1, 2, 2), "VALID")
    z = jax.lax.conv_general_dilated(z, w2, (1, 1), "VALID",
                                     dimension_numbers=dn, precision=hp)
    z = jnp.maximum(z + b2[None, :, None, None], 0.0)
    z = jax.lax.reduce_window(z, -jnp.inf, jax.lax.max, (1, 1, 2, 2), (1, 1, 2, 2), "VALID")
    z = z.reshape(z.shape[0], -1)                              # (N, 400), (c, h, w) order
    z = jnp.maximum(jnp.dot(z, wf1.T, precision=hp) + bf1, 0.0)
    z = jnp.maximum(jnp.dot(z, wf2.T, precision=hp) + bf2, 0.0)
    z = jnp.dot(z, wf3.T, precision=hp) + bf3
    return jax.nn.log_softmax(z, axis=1)


if __name__ == "__main__":
    key = jax.random.PRNGKey(0)
    ks = jax.random.split(key, 11)

    x = jax.random.uniform(ks[0], (N, C_IN, H_IN, W_IN), dtype=jnp.float32)
    params = (
        0.1 * jax.random.normal(ks[1], (C1, C_IN, KH, KW), jnp.float32),   # conv1.weight
        0.1 * jax.random.normal(ks[2], (C1,), jnp.float32),                # conv1.bias
        0.1 * jax.random.normal(ks[3], (C2, C1, KH, KW), jnp.float32),     # conv2.weight
        0.1 * jax.random.normal(ks[4], (C2,), jnp.float32),                # conv2.bias
        0.1 * jax.random.normal(ks[5], (F1, C2 * P2 * P2), jnp.float32),   # fc1.weight
        0.1 * jax.random.normal(ks[6], (F1,), jnp.float32),                # fc1.bias
        0.1 * jax.random.normal(ks[7], (F2, F1), jnp.float32),             # fc2.weight
        0.1 * jax.random.normal(ks[8], (F2,), jnp.float32),                # fc2.bias
        0.1 * jax.random.normal(ks[9], (NUM_CLASSES, F2), jnp.float32),    # fc3.weight
        0.1 * jax.random.normal(ks[10], (NUM_CLASSES,), jnp.float32),      # fc3.bias
    )

    out = cnn_cifar_forward(x, params)
    jax.block_until_ready(out)
    assert out.shape == (N, NUM_CLASSES)

    ref = cnn_cifar_reference(x, params)
    err = float(jnp.max(jnp.abs(out - ref)))
    # bf16 MXU inputs with f32 accumulation (per perf review) vs an f32/HIGHEST
    # reference: allow a slightly larger tolerance than the pure-f32 version.
    assert err < 3e-2, f"kernel vs reference mismatch: max abs err = {err}"

    print("KERNEL_OK")
</pallas_src>

<mosaic_0001>
module attributes {stable_mosaic.version = 11 : i64} {
  func.func @cnn_cifar_kernel(%arg0: memref<64x640xbf16, #tpu.memory_space<vmem>>, %arg1: memref<640x256xbf16, #tpu.memory_space<vmem>>, %arg2: memref<1x256xf32, #tpu.memory_space<vmem>>, %arg3: memref<640x256xbf16, #tpu.memory_space<vmem>>, %arg4: memref<1x256xf32, #tpu.memory_space<vmem>>, %arg5: memref<640x120xbf16, #tpu.memory_space<vmem>>, %arg6: memref<1x120xf32, #tpu.memory_space<vmem>>, %arg7: memref<120x84xbf16, #tpu.memory_space<vmem>>, %arg8: memref<1x84xf32, #tpu.memory_space<vmem>>, %arg9: memref<84x10xbf16, #tpu.memory_space<vmem>>, %arg10: memref<1x10xf32, #tpu.memory_space<vmem>>, %arg11: memref<2x10xf32, #tpu.memory_space<vmem>>) attributes {dimension_semantics = [], scalar_prefetch = 0 : i64, scratch_operands = 0 : i64, tpu.core_type = #tpu.core_type<tc>} {
    %c0 = arith.constant 0 : index
    %c0_0 = arith.constant 0 : index
    %0 = vector.load %arg0[%c0, %c0_0] : memref<64x640xbf16, #tpu.memory_space<vmem>>, vector<64x640xbf16>
    %c0_1 = arith.constant 0 : index
    %c0_2 = arith.constant 0 : index
    %1 = vector.load %arg1[%c0_1, %c0_2] : memref<640x256xbf16, #tpu.memory_space<vmem>>, vector<640x256xbf16>
    %cst = arith.constant dense<0.000000e+00> : vector<64x256xf32>
    %2 = tpu.matmul %0, %1, %cst {dimension_numbers = #tpu.dot_dimension_numbers<[1], [0], [0], [1], [0, 0, 1, 1], [], []>} : vector<64x640xbf16>, vector<640x256xbf16>, vector<64x256xf32> -> vector<64x256xf32>
    %c0_3 = arith.constant 0 : index
    %c0_4 = arith.constant 0 : index
    %3 = vector.load %arg2[%c0_3, %c0_4] : memref<1x256xf32, #tpu.memory_space<vmem>>, vector<1x256xf32>
    %4 = vector.broadcast %3 : vector<1x256xf32> to vector<64x256xf32>
    %5 = arith.addf %2, %4 : vector<64x256xf32>
    %cst_5 = arith.constant 0.000000e+00 : f32
    %6 = vector.broadcast %cst_5 : f32 to vector<64x256xf32>
    %7 = arith.maximumf %5, %6 : vector<64x256xf32>
    %8 = vector.extract_strided_slice %7 {offsets = [0, 0], sizes = [64, 128], strides = [1, 1]} : vector<64x256xf32> to vector<64x128xf32>
    %9 = vector.extract_strided_slice %7 {offsets = [0, 128], sizes = [64, 128], strides = [1, 1]} : vector<64x256xf32> to vector<64x128xf32>
    %10 = arith.maximumf %8, %9 : vector<64x128xf32>
    %11 = vector.extract_strided_slice %10 {offsets = [0, 0], sizes = [16, 128], strides = [1, 1]} : vector<64x128xf32> to vector<16x128xf32>
    %12 = vector.extract_strided_slice %10 {offsets = [16, 0], sizes = [16, 128], strides = [1, 1]} : vector<64x128xf32> to vector<16x128xf32>
    %13 = arith.maximumf %11, %12 : vector<16x128xf32>
    %14 = vector.extract_strided_slice %10 {offsets = [32, 0], sizes = [16, 128], strides = [1, 1]} : vector<64x128xf32> to vector<16x128xf32>
    %15 = vector.extract_strided_slice %10 {offsets = [48, 0], sizes = [16, 128], strides = [1, 1]} : vector<64x128xf32> to vector<16x128xf32>
    %16 = arith.maximumf %14, %15 : vector<16x128xf32>
    %cst_6 = arith.constant 0.000000e+00 : f32
    %17 = vector.broadcast %cst_6 : f32 to vector<8x128xf32>
    %18 = tpu.concatenate %13, %17 in 0 : vector<16x128xf32>, vector<8x128xf32> -> vector<24x128xf32>
    %19 = tpu.concatenate %16, %17 in 0 : vector<16x128xf32>, vector<8x128xf32> -> vector<24x128xf32>
    %20 = vector.extract_strided_slice %18 {offsets = [1, 0], sizes = [16, 128], strides = [1, 1]} : vector<24x128xf32> to vector<16x128xf32>
    %21 = vector.extract_strided_slice %19 {offsets = [1, 0], sizes = [16, 128], strides = [1, 1]} : vector<24x128xf32> to vector<16x128xf32>
    %22 = vector.extract_strided_slice %18 {offsets = [2, 0], sizes = [16, 128], strides = [1, 1]} : vector<24x128xf32> to vector<16x128xf32>
    %23 = tpu.concatenate %13, %16, %20, %21, %22 in 1 : vector<16x128xf32>, vector<16x128xf32>, vector<16x128xf32>, vector<16x128xf32>, vector<16x128xf32> -> vector<16x640xf32>
    %24 = vector.extract_strided_slice %18 {offsets = [1, 0], sizes = [16, 128], strides = [1, 1]} : vector<24x128xf32> to vector<16x128xf32>
    %25 = vector.extract_strided_slice %19 {offsets = [1, 0], sizes = [16, 128], strides = [1, 1]} : vector<24x128xf32> to vector<16x128xf32>
    %26 = vector.extract_strided_slice %18 {offsets = [2, 0], sizes = [16, 128], strides = [1, 1]} : vector<24x128xf32> to vector<16x128xf32>
    %27 = vector.extract_strided_slice %19 {offsets = [2, 0], sizes = [16, 128], strides = [1, 1]} : vector<24x128xf32> to vector<16x128xf32>
    %28 = tpu.concatenate %16, %24, %25, %26, %27 in 1 : vector<16x128xf32>, vector<16x128xf32>, vector<16x128xf32>, vector<16x128xf32>, vector<16x128xf32> -> vector<16x640xf32>
    %29 = tpu.concatenate %23, %28 in 0 : vector<16x640xf32>, vector<16x640xf32> -> vector<32x640xf32>
    %30 = arith.truncf %29 : vector<32x640xf32> to vector<32x640xbf16>
    %c0_7 = arith.constant 0 : index
    %c0_8 = arith.constant 0 : index
    %31 = vector.load %arg3[%c0_7, %c0_8] : memref<640x256xbf16, #tpu.memory_space<vmem>>, vector<640x256xbf16>
    %cst_9 = arith.constant dense<0.000000e+00> : vector<32x256xf32>
    %32 = tpu.matmul %30, %31, %cst_9 {dimension_numbers = #tpu.dot_dimension_numbers<[1], [0], [0], [1], [0, 0, 1, 1], [], []>} : vector<32x640xbf16>, vector<640x256xbf16>, vector<32x256xf32> -> vector<32x256xf32>
    %c0_10 = arith.constant 0 : index
    %c0_11 = arith.constant 0 : index
    %33 = vector.load %arg4[%c0_10, %c0_11] : memref<1x256xf32, #tpu.memory_space<vmem>>, vector<1x256xf32>
    %34 = vector.broadcast %33 : vector<1x256xf32> to vector<32x256xf32>
    %35 = arith.addf %32, %34 : vector<32x256xf32>
    %cst_12 = arith.constant 0.000000e+00 : f32
    %36 = vector.broadcast %cst_12 : f32 to vector<32x256xf32>
    %37 = arith.maximumf %35, %36 : vector<32x256xf32>
    %38 = vector.extract_strided_slice %37 {offsets = [0, 0], sizes = [32, 128], strides = [1, 1]} : vector<32x256xf32> to vector<32x128xf32>
    %39 = vector.extract_strided_slice %37 {offsets = [0, 128], sizes = [32, 128], strides = [1, 1]} : vector<32x256xf32> to vector<32x128xf32>
    %40 = arith.maximumf %38, %39 : vector<32x128xf32>
    %41 = vector.extract_strided_slice %40 {offsets = [0, 0], sizes = [16, 128], strides = [1, 1]} : vector<32x128xf32> to vector<16x128xf32>
    %42 = vector.extract_strided_slice %40 {offsets = [16, 0], sizes = [16, 128], strides = [1, 1]} : vector<32x128xf32> to vector<16x128xf32>
    %43 = arith.maximumf %41, %42 : vector<16x128xf32>
    %44 = vector.extract_strided_slice %43 {offsets = [0, 0], sizes = [1, 128], strides = [1, 1]} : vector<16x128xf32> to vector<1x128xf32>
    %45 = vector.extract_strided_slice %43 {offsets = [1, 0], sizes = [1, 128], strides = [1, 1]} : vector<16x128xf32> to vector<1x128xf32>
    %46 = vector.extract_strided_slice %43 {offsets = [2, 0], sizes = [1, 128], strides = [1, 1]} : vector<16x128xf32> to vector<1x128xf32>
    %47 = vector.extract_strided_slice %43 {offsets = [3, 0], sizes = [1, 128], strides = [1, 1]} : vector<16x128xf32> to vector<1x128xf32>
    %48 = vector.extract_strided_slice %43 {offsets = [4, 0], sizes = [1, 128], strides = [1, 1]} : vector<16x128xf32> to vector<1x128xf32>
    %49 = tpu.concatenate %44, %45, %46, %47, %48 in 1 : vector<1x128xf32>, vector<1x128xf32>, vector<1x128xf32>, vector<1x128xf32>, vector<1x128xf32> -> vector<1x640xf32>
    %50 = vector.extract_strided_slice %43 {offsets = [8, 0], sizes = [1, 128], strides = [1, 1]} : vector<16x128xf32> to vector<1x128xf32>
    %51 = vector.extract_strided_slice %43 {offsets = [9, 0], sizes = [1, 128], strides = [1, 1]} : vector<16x128xf32> to vector<1x128xf32>
    %52 = vector.extract_strided_slice %43 {offsets = [10, 0], sizes = [1, 128], strides = [1, 1]} : vector<16x128xf32> to vector<1x128xf32>
    %53 = vector.extract_strided_slice %43 {offsets = [11, 0], sizes = [1, 128], strides = [1, 1]} : vector<16x128xf32> to vector<1x128xf32>
    %54 = vector.extract_strided_slice %43 {offsets = [12, 0], sizes = [1, 128], strides = [1, 1]} : vector<16x128xf32> to vector<1x128xf32>
    %55 = tpu.concatenate %50, %51, %52, %53, %54 in 1 : vector<1x128xf32>, vector<1x128xf32>, vector<1x128xf32>, vector<1x128xf32>, vector<1x128xf32> -> vector<1x640xf32>
    %56 = tpu.concatenate %49, %55 in 0 : vector<1x640xf32>, vector<1x640xf32> -> vector<2x640xf32>
    %57 = arith.truncf %56 : vector<2x640xf32> to vector<2x640xbf16>
    %c0_13 = arith.constant 0 : index
    %c0_14 = arith.constant 0 : index
    %58 = vector.load %arg5[%c0_13, %c0_14] : memref<640x120xbf16, #tpu.memory_space<vmem>>, vector<640x120xbf16>
    %cst_15 = arith.constant dense<0.000000e+00> : vector<2x120xf32>
    %59 = tpu.matmul %57, %58, %cst_15 {dimension_numbers = #tpu.dot_dimension_numbers<[1], [0], [0], [1], [0, 0, 1, 1], [], []>} : vector<2x640xbf16>, vector<640x120xbf16>, vector<2x120xf32> -> vector<2x120xf32>
    %c0_16 = arith.constant 0 : index
    %c0_17 = arith.constant 0 : index
    %60 = vector.load %arg6[%c0_16, %c0_17] : memref<1x120xf32, #tpu.memory_space<vmem>>, vector<1x120xf32>
    %61 = vector.broadcast %60 : vector<1x120xf32> to vector<2x120xf32>
    %62 = arith.addf %59, %61 : vector<2x120xf32>
    %cst_18 = arith.constant 0.000000e+00 : f32
    %63 = vector.broadcast %cst_18 : f32 to vector<2x120xf32>
    %64 = arith.maximumf %62, %63 : vector<2x120xf32>
    %65 = arith.truncf %64 : vector<2x120xf32> to vector<2x120xbf16>
    %c0_19 = arith.constant 0 : index
    %c0_20 = arith.constant 0 : index
    %66 = vector.load %arg7[%c0_19, %c0_20] : memref<120x84xbf16, #tpu.memory_space<vmem>>, vector<120x84xbf16>
    %cst_21 = arith.constant dense<0.000000e+00> : vector<2x84xf32>
    %67 = tpu.matmul %65, %66, %cst_21 {dimension_numbers = #tpu.dot_dimension_numbers<[1], [0], [0], [1], [0, 0, 1, 1], [], []>} : vector<2x120xbf16>, vector<120x84xbf16>, vector<2x84xf32> -> vector<2x84xf32>
    %c0_22 = arith.constant 0 : index
    %c0_23 = arith.constant 0 : index
    %68 = vector.load %arg8[%c0_22, %c0_23] : memref<1x84xf32, #tpu.memory_space<vmem>>, vector<1x84xf32>
    %69 = vector.broadcast %68 : vector<1x84xf32> to vector<2x84xf32>
    %70 = arith.addf %67, %69 : vector<2x84xf32>
    %cst_24 = arith.constant 0.000000e+00 : f32
    %71 = vector.broadcast %cst_24 : f32 to vector<2x84xf32>
    %72 = arith.maximumf %70, %71 : vector<2x84xf32>
    %73 = arith.truncf %72 : vector<2x84xf32> to vector<2x84xbf16>
    %c0_25 = arith.constant 0 : index
    %c0_26 = arith.constant 0 : index
    %74 = vector.load %arg9[%c0_25, %c0_26] : memref<84x10xbf16, #tpu.memory_space<vmem>>, vector<84x10xbf16>
    %cst_27 = arith.constant dense<0.000000e+00> : vector<2x10xf32>
    %75 = tpu.matmul %73, %74, %cst_27 {dimension_numbers = #tpu.dot_dimension_numbers<[1], [0], [0], [1], [0, 0, 1, 1], [], []>} : vector<2x84xbf16>, vector<84x10xbf16>, vector<2x10xf32> -> vector<2x10xf32>
    %c0_28 = arith.constant 0 : index
    %c0_29 = arith.constant 0 : index
    %76 = vector.load %arg10[%c0_28, %c0_29] : memref<1x10xf32, #tpu.memory_space<vmem>>, vector<1x10xf32>
    %77 = vector.broadcast %76 : vector<1x10xf32> to vector<2x10xf32>
    %78 = arith.addf %75, %77 : vector<2x10xf32>
    %cst_30 = arith.constant dense<0xFF800000> : vector<2xf32>
    %79 = vector.multi_reduction <maximumf>, %78, %cst_30 [1] : vector<2x10xf32> to vector<2xf32>
    %80 = vector.shape_cast %79 : vector<2xf32> to vector<2x1xf32>
    %81 = vector.broadcast %80 : vector<2x1xf32> to vector<2x10xf32>
    %82 = arith.subf %78, %81 : vector<2x10xf32>
    %83 = math.exp %82 : vector<2x10xf32>
    %cst_31 = arith.constant dense<0.000000e+00> : vector<2xf32>
    %84 = vector.multi_reduction <add>, %83, %cst_31 [1] : vector<2x10xf32> to vector<2xf32>
    %85 = vector.shape_cast %84 : vector<2xf32> to vector<2x1xf32>
    %86 = math.log %85 : vector<2x1xf32>
    %87 = vector.broadcast %86 : vector<2x1xf32> to vector<2x10xf32>
    %88 = arith.subf %82, %87 : vector<2x10xf32>
    %c0_32 = arith.constant 0 : index
    %c0_33 = arith.constant 0 : index
    %89 = vector.load %arg11[%c0_32, %c0_33] : memref<2x10xf32, #tpu.memory_space<vmem>>, vector<2x10xf32>
    tpu.vector_store %arg11[%c0_32, %c0_33], %88 {strides = array<i32>} : memref<2x10xf32, #tpu.memory_space<vmem>>, vector<2x10xf32>,
    return
  }
}

</mosaic_0001>

<bundles_post_ra>
// kernel: cnn_cifar_forward.1
= control target key start
LH: loop header
LB: loop body
LE: loop exit
PB: predicated region body
PF: predicated region fallthrough
CT: control target
= control target key end

     0   :  { %s4036_s0 = inlined_call_operand.vmem [shape: bf16[64,640], index: 0, kind: input, shape index: {}]   ;;  %s4037_s1 = inlined_call_operand.vmem [shape: bf16[640,256], index: 1, kind: input, shape index: {}]   ;;  %s4038_s2 = inlined_call_operand.vmem [shape: f32[1,256], index: 2, kind: input, shape index: {}]   ;;  %s4039_s3 = inlined_call_operand.vmem [shape: bf16[640,256], index: 3, kind: input, shape index: {}]   ;;  %s4040_s4 = inlined_call_operand.vmem [shape: f32[1,256], index: 4, kind: input, shape index: {}]   ;;  %s4041_s5 = inlined_call_operand.vmem [shape: bf16[640,120], index: 5, kind: input, shape index: {}]   ;;  %s4042_s6 = inlined_call_operand.vmem [shape: f32[1,120], index: 6, kind: input, shape index: {}]   ;;  %s4043_s7 = inlined_call_operand.vmem [shape: bf16[120,84], index: 7, kind: input, shape index: {}]   ;;  %s4044_s8 = inlined_call_operand.vmem [shape: f32[1,84], index: 8, kind: input, shape index: {}]   ;;  %s4045_s9 = inlined_call_operand.vmem [shape: bf16[84,10], index: 9, kind: input, shape index: {}]   ;;  %s4046_s10 = inlined_call_operand.vmem [shape: f32[1,10], index: 10, kind: input, shape index: {}]   ;;  %s4047_s11 = inlined_call_operand.hbm [shape: f32[2,10], index: 11, kind: output, shape index: {}]  }
   0x1   :  { %v2783_v0 = vld [vmem:[%s4037_s1 + $0x4] ss:$8 sps:$4 sm:$0xff]   ;;  %v2785_v1 = vld [vmem:[%s4037_s1] ss:$8 sps:$4 sm:$0xff]   ;;  %v2786_v2 = vld [vmem:[%s4037_s1 + $0x14] ss:$8 sps:$4 sm:$0xff]  }
   0x2   :  { %660 = vmatprep.subr.bf16.mxu0 %v2783_v0  ;;  %v2788_v3 = vld [vmem:[%s4037_s1 + $0x10] ss:$8 sps:$4 sm:$0xff]   ;;  %v2789_v4 = vld [vmem:[%s4037_s1 + $0x24] ss:$8 sps:$4 sm:$0xff]   ;;  %v2791_v5 = vld [vmem:[%s4037_s1 + $0x20] ss:$8 sps:$4 sm:$0xff]  }
   0x3   :  { %661 = vmatpush1.bf16.msra.mxu0 %v2785_v1  ;;  %v2792_v6 = vld [vmem:[%s4037_s1 + $0x34] ss:$8 sps:$4 sm:$0xff]   ;;  %v2794_v7 = vld [vmem:[%s4037_s1 + $0x30] ss:$8 sps:$4 sm:$0xff]   ;;  %v2795_v8 = vld [vmem:[%s4037_s1 + $0x44] ss:$8 sps:$4 sm:$0xff]  }
   0x4   :  { %662 = vmatprep.subr.bf16.mxu0 %v2786_v2  ;;  %v2797_v9 = vld [vmem:[%s4037_s1 + $0x40] ss:$8 sps:$4 sm:$0xff]   ;;  %v2798_v10 = vld [vmem:[%s4037_s1 + $0x54] ss:$8 sps:$4 sm:$0xff]   ;;  %v2800_v11 = vld [vmem:[%s4037_s1 + $0x50] ss:$8 sps:$4 sm:$0xff]  }
   0x5   :  { %v2801_v12 = vld [vmem:[%s4037_s1 + $0x64] ss:$8 sps:$4 sm:$0xff]   ;;  %v2803_v14 = vld [vmem:[%s4037_s1 + $0x60] ss:$8 sps:$4 sm:$0xff]   ;;  %v2804_v15 = vld [vmem:[%s4037_s1 + $0x74] ss:$8 sps:$4 sm:$0xff]  }
   0x6   :  { %v2833_v13 = vld [vmem:[%s4036_s0 + $0x4] ss:$20 sps:$4 sm:$0xff]   ;;  %v2809_v18 = vld [vmem:[%s4037_s1 + $0x80] ss:$8 sps:$4 sm:$0xff]   ;;  %v2810_v19 = vld [vmem:[%s4037_s1 + $0x94] ss:$8 sps:$4 sm:$0xff]  }
   0x7   :  { %663 = vmatpush1.bf16.msra.mxu0 %v2788_v3  ;;  %692 = vmatprep.mubr.bf16.mxu0 %v2833_v13  ;;  %v2806_v16 = vld [vmem:[%s4037_s1 + $0x70] ss:$8 sps:$4 sm:$0xff]   ;;  %v2807_v17 = vld [vmem:[%s4037_s1 + $0x84] ss:$8 sps:$4 sm:$0xff]   ;;  %v2815_v22 = vld [vmem:[%s4037_s1 + $0xa0] ss:$8 sps:$4 sm:$0xff]  }
   0x8   :  { %664 = vmatprep.subr.bf16.mxu0 %v2789_v4  ;;  %v2812_v20 = vld [vmem:[%s4037_s1 + $0x90] ss:$8 sps:$4 sm:$0xff]   ;;  %v2813_v21 = vld [vmem:[%s4037_s1 + $0xa4] ss:$8 sps:$4 sm:$0xff]   ;;  %v2816_v23 = vld [vmem:[%s4037_s1 + $0xb4] ss:$8 sps:$4 sm:$0xff]  }
   0x9   :  { %v2818_v24 = vld [vmem:[%s4037_s1 + $0xb0] ss:$8 sps:$4 sm:$0xff]   ;;  %v2819_v25 = vld [vmem:[%s4037_s1 + $0xc4] ss:$8 sps:$4 sm:$0xff]   ;;  %v2821_v26 = vld [vmem:[%s4037_s1 + $0xc0] ss:$8 sps:$4 sm:$0xff]  }
   0xa   :  { %v2822_v27 = vld [vmem:[%s4037_s1 + $0xd4] ss:$8 sps:$4 sm:$0xff]   ;;  %v2824_v28 = vld [vmem:[%s4037_s1 + $0xd0] ss:$8 sps:$4 sm:$0xff]   ;;  %v2825_v29 = vld [vmem:[%s4037_s1 + $0xe4] ss:$8 sps:$4 sm:$0xff]  }
   0xb   :  { %665 = vmatpush1.bf16.msra.mxu0 %v2791_v5  ;;  %v2827_v30 = vld [vmem:[%s4037_s1 + $0xe0] ss:$8 sps:$4 sm:$0xff]   ;;  %v2828_v31 = vld [vmem:[%s4037_s1 + $0xf4] ss:$8 sps:$4 sm:$0xff]   ;;  %v2830_v32 = vld [vmem:[%s4037_s1 + $0xf0] ss:$8 sps:$4 sm:$0xff]  }
   0xc   :  { %666 = vmatprep.subr.bf16.mxu0 %v2792_v6  ;;  %v2836_v33 = vld [vmem:[%s4037_s1 + $0x104] ss:$8 sps:$4 sm:$0xff]   ;;  %v2831_v34 = vld [vmem:[%s4036_s0] ss:$20 sps:$4 sm:$0xff]   ;;  %v2837_v38 = vld [vmem:[%s4037_s1 + $0x110] ss:$8 sps:$4 sm:$0xff]  }
   0xd   :  { %v2834_v35 = vld [vmem:[%s4037_s1 + $0x100] ss:$8 sps:$4 sm:$0xff]   ;;  %v2839_v37 = vld [vmem:[%s4037_s1 + $0x114] ss:$8 sps:$4 sm:$0xff]   ;;  %v2842_v39 = vld [vmem:[%s4037_s1 + $0x124] ss:$8 sps:$4 sm:$0xff]  }
   0xe   :  { %v2864_v36 = vld [vmem:[%s4036_s0 + $0x2c] ss:$20 sps:$4 sm:$0xff]   ;;  %v2866_v43 = vld [vmem:[%s4036_s0 + $0x28] ss:$20 sps:$4 sm:$0xff]   ;;  %v2936_v47 = vld [vmem:[%s4039_s3 + $0x10] ss:$8 sps:$4 sm:$0xff]  }
   0xf   :  { %667 = vmatpush1.bf16.msra.mxu0 %v2794_v7  ;;  %v2931_v40 = vld [vmem:[%s4039_s3 + $0x4] ss:$8 sps:$4 sm:$0xff]   ;;  %v2840_v41 = vld [vmem:[%s4037_s1 + $0x120] ss:$8 sps:$4 sm:$0xff]   ;;  %v2934_v44 = vld [vmem:[%s4039_s3 + $0x14] ss:$8 sps:$4 sm:$0xff]  }
  0x10   :  { %668 = vmatprep.subr.bf16.mxu0 %v2795_v8  ;;  %v2933_v42 = vld [vmem:[%s4039_s3] ss:$8 sps:$4 sm:$0xff]   ;;  %1438 = vmatprep.subr.bf16.mxu1 %v2931_v40  ;;  %v2845_v45 = vld [vmem:[%s4037_s1 + $0x134] ss:$8 sps:$4 sm:$0xff]   ;;  %v2937_v48 = vld [vmem:[%s4039_s3 + $0x24] ss:$8 sps:$4 sm:$0xff]  }
  0x11   :  { %v2873_v46 = vld [vmem:[%s4036_s0 + $0x54] ss:$20 sps:$4 sm:$0xff]   ;;  %1439 = vmatpush1.bf16.msra.mxu1 %v2933_v42  ;;  %v2843_v49 = vld [vmem:[%s4037_s1 + $0x130] ss:$8 sps:$4 sm:$0xff]   ;;  %v2848_v50 = vld [vmem:[%s4037_s1 + $0x144] ss:$8 sps:$4 sm:$0xff]  }
  0x12   :  { %1440 = vmatprep.subr.bf16.mxu1 %v2934_v44  ;;  %v2875_v51 = vld [vmem:[%s4036_s0 + $0x50] ss:$20 sps:$4 sm:$0xff]   ;;  %v2939_v52 = vld [vmem:[%s4039_s3 + $0x20] ss:$8 sps:$4 sm:$0xff]   ;;  %v2940_v55 = vld [vmem:[%s4039_s3 + $0x34] ss:$8 sps:$4 sm:$0xff]  }
  0x13   :  { %669 = vmatpush1.bf16.msra.mxu0 %v2797_v9  ;;  %v2846_v53 = vld [vmem:[%s4037_s1 + $0x140] ss:$8 sps:$4 sm:$0xff]   ;;  %v2882_v54 = vld [vmem:[%s4036_s0 + $0x7c] ss:$20 sps:$4 sm:$0xff]   ;;  %v2943_v58 = vld [vmem:[%s4039_s3 + $0x44] ss:$8 sps:$4 sm:$0xff]  }
  0x14   :  { %670 = vmatprep.subr.bf16.mxu0 %v2798_v10  ;;  %v2851_v56 = vld [vmem:[%s4037_s1 + $0x154] ss:$8 sps:$4 sm:$0xff]   ;;  %v2942_v57 = vld [vmem:[%s4039_s3 + $0x30] ss:$8 sps:$4 sm:$0xff]   ;;  %v2854_v60 = vld [vmem:[%s4037_s1 + $0x164] ss:$8 sps:$4 sm:$0xff]  }
  0x15   :  { %1441 = vmatpush1.bf16.msra.mxu1 %v2936_v47  ;;  %v2849_v59 = vld [vmem:[%s4037_s1 + $0x150] ss:$8 sps:$4 sm:$0xff]   ;;  %v2945_v61 = vld [vmem:[%s4039_s3 + $0x40] ss:$8 sps:$4 sm:$0xff]   ;;  %v2946_v62 = vld [vmem:[%s4039_s3 + $0x54] ss:$8 sps:$4 sm:$0xff]  }
  0x16   :  { %1442 = vmatprep.subr.bf16.mxu1 %v2937_v48  ;;  %v2884_v63 = vld [vmem:[%s4036_s0 + $0x78] ss:$20 sps:$4 sm:$0xff]   ;;  %v2852_v0 = vld [vmem:[%s4037_s1 + $0x160] ss:$8 sps:$4 sm:$0xff]   ;;  %v2857_v2 = vld [vmem:[%s4037_s1 + $0x174] ss:$8 sps:$4 sm:$0xff]  }
  0x17   :  { %671 = vmatpush1.bf16.msra.mxu0 %v2800_v11  ;;  %v2893_v1 = vld [vmem:[%s4036_s0 + $0xc] ss:$20 sps:$4 sm:$0xff]   ;;  %v2948_v3 = vld [vmem:[%s4039_s3 + $0x50] ss:$8 sps:$4 sm:$0xff]   ;;  %v2863_v9 = vld [vmem:[%s4037_s1 + $0x194] ss:$8 sps:$4 sm:$0xff]  }
  0x18   :  { %672 = vmatprep.subr.bf16.mxu0 %v2801_v12  ;;  %v2949_v4 = vld [vmem:[%s4039_s3 + $0x64] ss:$8 sps:$4 sm:$0xff]   ;;  %v2855_v5 = vld [vmem:[%s4037_s1 + $0x170] ss:$8 sps:$4 sm:$0xff]   ;;  %v2951_v7 = vld [vmem:[%s4039_s3 + $0x60] ss:$8 sps:$4 sm:$0xff]  }
  0x19   :  { %1443 = vmatpush1.bf16.msra.mxu1 %v2939_v52  ;;  %v2860_v6 = vld [vmem:[%s4037_s1 + $0x184] ss:$8 sps:$4 sm:$0xff]   ;;  %v2858_v8 = vld [vmem:[%s4037_s1 + $0x180] ss:$8 sps:$4 sm:$0xff]   ;;  %v2861_v10 = vld [vmem:[%s4037_s1 + $0x190] ss:$8 sps:$4 sm:$0xff]  }
  0x1a   :  { %1444 = vmatprep.subr.bf16.mxu1 %v2940_v55  ;;  %v2869_v11 = vld [vmem:[%s4037_s1 + $0x1a4] ss:$8 sps:$4 sm:$0xff]   ;;  %v2867_v12 = vld [vmem:[%s4037_s1 + $0x1a0] ss:$8 sps:$4 sm:$0xff]   ;;  %v2872_v13 = vld [vmem:[%s4037_s1 + $0x1b4] ss:$8 sps:$4 sm:$0xff]  }
  0x1b   :  { %673 = vmatpush1.bf16.msra.mxu0 %v2803_v14  ;;  %v2870_v14 = vld [vmem:[%s4037_s1 + $0x1b0] ss:$8 sps:$4 sm:$0xff]  }
  0x1c   :  { %674 = vmatprep.subr.bf16.mxu0 %v2804_v15  ;;  %v2878_v15 = vld [vmem:[%s4037_s1 + $0x1c4] ss:$8 sps:$4 sm:$0xff]  }
  0x1d   :  { %1445 = vmatpush1.bf16.msra.mxu1 %v2942_v57 }
  0x1e   :  { %1446 = vmatprep.subr.bf16.mxu1 %v2943_v58 }
  0x1f   :  { %675 = vmatpush1.bf16.msra.mxu0 %v2806_v16  ;;  %v2876_v16 = vld [vmem:[%s4037_s1 + $0x1c0] ss:$8 sps:$4 sm:$0xff]  }
  0x20   :  { %676 = vmatprep.subr.bf16.mxu0 %v2807_v17  ;;  %v2881_v17 = vld [vmem:[%s4037_s1 + $0x1d4] ss:$8 sps:$4 sm:$0xff]  }
  0x21   :  { %1447 = vmatpush1.bf16.msra.mxu1 %v2945_v61 }
  0x22   :  { %1448 = vmatprep.subr.bf16.mxu1 %v2946_v62 }
  0x23   :  { %677 = vmatpush1.bf16.msra.mxu0 %v2809_v18  ;;  %v2879_v18 = vld [vmem:[%s4037_s1 + $0x1d0] ss:$8 sps:$4 sm:$0xff]  }
  0x24   :  { %678 = vmatprep.subr.bf16.mxu0 %v2810_v19  ;;  %v2887_v19 = vld [vmem:[%s4037_s1 + $0x1e4] ss:$8 sps:$4 sm:$0xff]  }
  0x25   :  { %1449 = vmatpush1.bf16.msra.mxu1 %v2948_v3 }
  0x26   :  { %1450 = vmatprep.subr.bf16.mxu1 %v2949_v4 }
  0x27   :  { %679 = vmatpush1.bf16.msra.mxu0 %v2812_v20  ;;  %v2885_v20 = vld [vmem:[%s4037_s1 + $0x1e0] ss:$8 sps:$4 sm:$0xff]  }
  0x28   :  { %680 = vmatprep.subr.bf16.mxu0 %v2813_v21  ;;  %v2890_v21 = vld [vmem:[%s4037_s1 + $0x1f4] ss:$8 sps:$4 sm:$0xff]  }
  0x29   :  { %1451 = vmatpush1.bf16.msra.mxu1 %v2951_v7 }
  0x2b   :  { %681 = vmatpush1.bf16.msra.mxu0 %v2815_v22  ;;  %v2888_v22 = vld [vmem:[%s4037_s1 + $0x1f0] ss:$8 sps:$4 sm:$0xff]  }
  0x2c   :  { %682 = vmatprep.subr.bf16.mxu0 %v2816_v23  ;;  %v2896_v23 = vld [vmem:[%s4037_s1 + $0x204] ss:$8 sps:$4 sm:$0xff]  }
  0x2f   :  { %683 = vmatpush1.bf16.msra.mxu0 %v2818_v24  ;;  %v2891_v24 = vld [vmem:[%s4036_s0 + $0x8] ss:$20 sps:$4 sm:$0xff]  }
  0x30   :  { %684 = vmatprep.subr.bf16.mxu0 %v2819_v25  ;;  %v2894_v25 = vld [vmem:[%s4037_s1 + $0x200] ss:$8 sps:$4 sm:$0xff]  }
  0x33   :  { %685 = vmatpush1.bf16.msra.mxu0 %v2821_v26  ;;  %v2900_v26 = vld [vmem:[%s4036_s0 + $0x34] ss:$20 sps:$4 sm:$0xff]  }
  0x34   :  { %686 = vmatprep.subr.bf16.mxu0 %v2822_v27  ;;  %v2899_v27 = vld [vmem:[%s4037_s1 + $0x214] ss:$8 sps:$4 sm:$0xff]  }
  0x37   :  { %687 = vmatpush1.bf16.msra.mxu0 %v2824_v28  ;;  %v2897_v28 = vld [vmem:[%s4037_s1 + $0x210] ss:$8 sps:$4 sm:$0xff]  }
  0x38   :  { %688 = vmatprep.subr.bf16.mxu0 %v2825_v29  ;;  %v2905_v29 = vld [vmem:[%s4037_s1 + $0x224] ss:$8 sps:$4 sm:$0xff]  }
  0x3b   :  { %689 = vmatpush1.bf16.msra.mxu0 %v2827_v30  ;;  %v2902_v30 = vld [vmem:[%s4036_s0 + $0x30] ss:$20 sps:$4 sm:$0xff]  }
  0x3c   :  { %690 = vmatprep.subr.bf16.mxu0 %v2828_v31  ;;  %v2903_v31 = vld [vmem:[%s4037_s1 + $0x220] ss:$8 sps:$4 sm:$0xff]  }
  0x3f   :  { %691 = vmatpush1.bf16.msra.mxu0 %v2830_v32  ;;  %v2909_v32 = vld [vmem:[%s4036_s0 + $0x5c] ss:$20 sps:$4 sm:$0xff]  }
  0x40   :  { %733 = vmatprep.subr.bf16.mxu0 %v2836_v33 }
  0x42   :  { %693 = vmatmul.mubr.bf16.vlgmr.msra.gmra.mrb[0].mxu0 %v2831_v34 }
  0x43   :  { %734 = vmatpush1.bf16.msra.mxu0 %v2834_v35  ;;  %702 = vmatprep.mubr.bf16.mxu0 %v2864_v36 }
  0x44   :  { %735 = vmatprep.subr.bf16.mxu0 %v2839_v37 }
  0x47   :  { %736 = vmatpush1.bf16.msra.mxu0 %v2837_v38 }
  0x48   :  { %737 = vmatprep.subr.bf16.mxu0 %v2842_v39 }
  0x4a   :  { %703 = vmatmul.mubr.bf16.gmra.mrb[4].mxu0 %v2866_v43 }
  0x4b   :  { %738 = vmatpush1.bf16.msra.mxu0 %v2840_v41  ;;  %712 = vmatprep.mubr.bf16.mxu0 %v2873_v46 }
  0x4c   :  { %739 = vmatprep.subr.bf16.mxu0 %v2845_v45 }
  0x4f   :  { %740 = vmatpush1.bf16.msra.mxu0 %v2843_v49 }
  0x50   :  { %741 = vmatprep.subr.bf16.mxu0 %v2848_v50 }
  0x52   :  { %713 = vmatmul.mubr.bf16.gmra.mrb[8].mxu0 %v2875_v51 }
  0x53   :  { %742 = vmatpush1.bf16.msra.mxu0 %v2846_v53  ;;  %722 = vmatprep.mubr.bf16.mxu0 %v2882_v54 }
  0x54   :  { %743 = vmatprep.subr.bf16.mxu0 %v2851_v56 }
  0x57   :  { %744 = vmatpush1.bf16.msra.mxu0 %v2849_v59 }
  0x58   :  { %745 = vmatprep.subr.bf16.mxu0 %v2854_v60 }
  0x5a   :  { %723 = vmatmul.mubr.bf16.gmra.mrb[12].mxu0 %v2884_v63 }
  0x5b   :  { %746 = vmatpush1.bf16.msra.mxu0 %v2852_v0  ;;  %765 = vmatprep.mubr.bf16.mxu0 %v2893_v1 }
  0x5c   :  { %747 = vmatprep.subr.bf16.mxu0 %v2857_v2 }
  0x5f   :  { %748 = vmatpush1.bf16.msra.mxu0 %v2855_v5 }
  0x60   :  { %749 = vmatprep.subr.bf16.mxu0 %v2860_v6 }
  0x63   :  { %750 = vmatpush1.bf16.msra.mxu0 %v2858_v8 }
  0x64   :  { %751 = vmatprep.subr.bf16.mxu0 %v2863_v9 }
  0x67   :  { %752 = vmatpush1.bf16.msra.mxu0 %v2861_v10 }
  0x68   :  { %753 = vmatprep.subr.bf16.mxu0 %v2869_v11 }
  0x6b   :  { %754 = vmatpush1.bf16.msra.mxu0 %v2867_v12 }
  0x6c   :  { %755 = vmatprep.subr.bf16.mxu0 %v2872_v13 }
  0x6f   :  { %756 = vmatpush1.bf16.msra.mxu0 %v2870_v14 }
  0x70   :  { %757 = vmatprep.subr.bf16.mxu0 %v2878_v15 }
  0x73   :  { %758 = vmatpush1.bf16.msra.mxu0 %v2876_v16 }
  0x74   :  { %759 = vmatprep.subr.bf16.mxu0 %v2881_v17 }
  0x77   :  { %760 = vmatpush1.bf16.msra.mxu0 %v2879_v18 }
  0x78   :  { %761 = vmatprep.subr.bf16.mxu0 %v2887_v19 }
  0x7b   :  { %762 = vmatpush1.bf16.msra.mxu0 %v2885_v20 }
  0x7c   :  { %763 = vmatprep.subr.bf16.mxu0 %v2890_v21 }
  0x7f   :  { %764 = vmatpush1.bf16.msra.mxu0 %v2888_v22 }
  0x80   :  { %806 = vmatprep.subr.bf16.mxu0 %v2896_v23 }
  0x82   :  { %766 = vmatmul.mubr.bf16.vlgmr.msra.gmra.mrb[0].mxu0 %v2891_v24 }
  0x83   :  { %807 = vmatpush1.bf16.msra.mxu0 %v2894_v25  ;;  %775 = vmatprep.mubr.bf16.mxu0 %v2900_v26 }
  0x84   :  { %808 = vmatprep.subr.bf16.mxu0 %v2899_v27 }
  0x87   :  { %809 = vmatpush1.bf16.msra.mxu0 %v2897_v28 }
  0x88   :  { %16 = vsyncpa [#allocation3], 0  ;;  %810 = vmatprep.subr.bf16.mxu0 %v2905_v29  ;;  %v2908_v33 = vld [vmem:[%s4037_s1 + $0x234] ss:$8 sps:$4 sm:$0xff]   ;;  %v2906_v34 = vld [vmem:[%s4037_s1 + $0x230] ss:$8 sps:$4 sm:$0xff]   ;;  %v146_v6 = vlaneseq }
  0x89   :  { %v2914_v35 = vld [vmem:[%s4037_s1 + $0x244] ss:$8 sps:$4 sm:$0xff]   ;;  %v2912_v37 = vld [vmem:[%s4037_s1 + $0x240] ss:$8 sps:$4 sm:$0xff]   ;;  %v2917_v39 = vld [vmem:[%s4037_s1 + $0x254] ss:$8 sps:$4 sm:$0xff]  }
  0x8a   :  { %776 = vmatmul.mubr.bf16.gmra.mrb[4].mxu0 %v2902_v30  ;;  %v2911_v36 = vld [vmem:[%s4036_s0 + $0x58] ss:$20 sps:$4 sm:$0xff]   ;;  %v2920_v42 = vld [vmem:[%s4036_s0 + $0x80] ss:$20 sps:$4 sm:$0xff]   ;;  %v3133_v46 = vmov 0   ;;  %v3600_v7 = vshrl.u32 %v146_v6, 7 }
  0x8b   :  { %811 = vmatpush1.bf16.msra.mxu0 %v2903_v31  ;;  %785 = vmatprep.mubr.bf16.mxu0 %v2909_v32  ;;  %v2918_v38 = vld [vmem:[%s4036_s0 + $0x84] ss:$20 sps:$4 sm:$0xff]   ;;  %v2921_v43 = vld [vmem:[%s4037_s1 + $0x260] ss:$8 sps:$4 sm:$0xff]   ;;  %v2926_v44 = vld [vmem:[%s4037_s1 + $0x274] ss:$8 sps:$4 sm:$0xff]  }
  0x8c   :  { %812 = vmatprep.subr.bf16.mxu0 %v2908_v33  ;;  %v2915_v40 = vld [vmem:[%s4037_s1 + $0x250] ss:$8 sps:$4 sm:$0xff]   ;;  %v2923_v41 = vld [vmem:[%s4037_s1 + $0x264] ss:$8 sps:$4 sm:$0xff]   ;;  %v2929_v49 = vld [vmem:[%s4036_s0 + $0x60] ss:$20 sps:$4 sm:$0xff]  }
  0x8d   :  { %v2924_v45 = vld [vmem:[%s4037_s1 + $0x270] ss:$8 sps:$4 sm:$0xff]   ;;  %v2930_v50 = vld [vmem:[%s4036_s0 + $0x88] ss:$20 sps:$4 sm:$0xff]   ;;  %v2955_v53 = vld [vmem:[%s4039_s3 + $0x84] ss:$8 sps:$4 sm:$0xff]  }
  0x8e   :  { %v2927_v47 = vld [vmem:[%s4036_s0 + $0x10] ss:$20 sps:$4 sm:$0xff]   ;;  %v2928_v48 = vld [vmem:[%s4036_s0 + $0x38] ss:$20 sps:$4 sm:$0xff]   ;;  %v2952_v51 = vld [vmem:[%s4039_s3 + $0x74] ss:$8 sps:$4 sm:$0xff]  }
  0x8f   :  { %813 = vmatpush1.bf16.msra.mxu0 %v2906_v34  ;;  %v2954_v52 = vld [vmem:[%s4039_s3 + $0x70] ss:$8 sps:$4 sm:$0xff]   ;;  %1452 = vmatprep.subr.bf16.mxu1 %v2952_v51  ;;  %v2957_v54 = vld [vmem:[%s4039_s3 + $0x80] ss:$8 sps:$4 sm:$0xff]   ;;  %v2958_v55 = vld [vmem:[%s4039_s3 + $0x94] ss:$8 sps:$4 sm:$0xff]  }
  0x90   :  { %814 = vmatprep.subr.bf16.mxu0 %v2914_v35  ;;  %1453 = vmatpush1.bf16.msra.mxu1 %v2954_v52  ;;  %v2960_v56 = vld [vmem:[%s4039_s3 + $0x90] ss:$8 sps:$4 sm:$0xff]   ;;  %v2961_v57 = vld [vmem:[%s4039_s3 + $0xa4] ss:$8 sps:$4 sm:$0xff]   ;;  %v2963_v58 = vld [vmem:[%s4039_s3 + $0xa0] ss:$8 sps:$4 sm:$0xff]  }
  0x91   :  { %1454 = vmatprep.subr.bf16.mxu1 %v2955_v53  ;;  %v2964_v59 = vld [vmem:[%s4039_s3 + $0xb4] ss:$8 sps:$4 sm:$0xff]   ;;  %v2966_v60 = vld [vmem:[%s4039_s3 + $0xb0] ss:$8 sps:$4 sm:$0xff]   ;;  %v2967_v61 = vld [vmem:[%s4039_s3 + $0xc4] ss:$8 sps:$4 sm:$0xff]  }
  0x92   :  { %786 = vmatmul.mubr.bf16.gmra.mrb[8].mxu0 %v2911_v36  ;;  %v2969_v62 = vld [vmem:[%s4039_s3 + $0xc0] ss:$8 sps:$4 sm:$0xff]   ;;  %v2970_v63 = vld [vmem:[%s4039_s3 + $0xd4] ss:$8 sps:$4 sm:$0xff]   ;;  %v2972_v0 = vld [vmem:[%s4039_s3 + $0xd0] ss:$8 sps:$4 sm:$0xff]  }
  0x93   :  { %815 = vmatpush1.bf16.msra.mxu0 %v2912_v37  ;;  %795 = vmatprep.mubr.bf16.mxu0 %v2918_v38  ;;  %v2973_v1 = vld [vmem:[%s4039_s3 + $0xe4] ss:$8 sps:$4 sm:$0xff]   ;;  %v2975_v2 = vld [vmem:[%s4039_s3 + $0xe0] ss:$8 sps:$4 sm:$0xff]   ;;  %v2976_v3 = vld [vmem:[%s4039_s3 + $0xf4] ss:$8 sps:$4 sm:$0xff]  }
  0x94   :  { %816 = vmatprep.subr.bf16.mxu0 %v2917_v39  ;;  %1455 = vmatpush1.bf16.msra.mxu1 %v2957_v54  ;;  %v2978_v4 = vld [vmem:[%s4039_s3 + $0xf0] ss:$8 sps:$4 sm:$0xff]   ;;  %v2981_v5 = vld [vmem:[%s4039_s3 + $0x104] ss:$8 sps:$4 sm:$0xff]   ;;  %v148_v8 = vsub.s32 0, %v3600_v7  ;;  %v152_v10 = vsub.s32 1, %v3600_v7 }
  0x95   :  { %1456 = vmatprep.subr.bf16.mxu1 %v2958_v55  ;;  %v144_v9 = vld [vmem:[%s4038_s2] sm:$0x3]  ;;  %vm910_vm0 = vcmask 1046528   ;;  %v3056_v55 = vld [vmem:[%s4041_s5 + $0x8] sm:$0xff]   ;;  %vm926_vm1 = vcmask 1045504   ;;  %vm1635_vm2 = vcmask 1040384  }
  0x96   :  { %v3609_v11 = vrot.slane %v144_v9, %v148_v8  ;;  %v3613_v12 = vrot.slane %v144_v9, %v152_v10  ;;  %vm3135_vm3 = vmmov 0   ;;  %vm2166_vm4 = vcmask 1043456  }
  0x97   :  { %817 = vmatpush1.bf16.msra.mxu0 %v2915_v40  ;;  %v3051_v40 = vld [vmem:[%s4041_s5 + $0x40] sm:$0xff]   ;;  %vm2162_vm5 = vcmask 982016   ;;  %vm2267_vm6 = vcmask 1041408   ;;  %vm2263_vm7 = vcmask 687104   ;;  %vm2311_vm8 = vcmask 74752  }
  0x98   :  { %818 = vmatprep.subr.bf16.mxu0 %v2923_v41  ;;  %1457 = vmatpush1.bf16.msra.mxu1 %v2960_v56  ;;  %v3052_v41 = vld [vmem:[%s4041_s5] sm:$0xff]  }
  0x99   :  { %1458 = vmatprep.subr.bf16.mxu1 %v2961_v57 }
  0x9a   :  { %796 = vmatmul.mubr.bf16.gmra.mrb[12].mxu0 %v2920_v42 }
  0x9b   :  { %819 = vmatpush1.bf16.msra.mxu0 %v2921_v43  ;;  %838 = vmatprep.mubr.bf16.mxu0 %v3133_v46 }
  0x9c   :  { %820 = vmatprep.subr.bf16.mxu0 %v2926_v44  ;;  %1459 = vmatpush1.bf16.msra.mxu1 %v2963_v58 }
  0x9d   :  { %1460 = vmatprep.subr.bf16.mxu1 %v2964_v59 }
  0x9f   :  { %821 = vmatpush1.bf16.msra.mxu0 %v2924_v45  ;;  %v3055_v45 = vld [vmem:[%s4041_s5 + $0x48] sm:$0xff]  }
  0xa0   :  { %1461 = vmatpush1.bf16.msra.mxu1 %v2966_v60  ;;  %2582 = vmatprep.subr.bf16.mxu0 %v3051_v40 }
  0xa1   :  { %1462 = vmatprep.subr.bf16.mxu1 %v2967_v61 }
  0xa2   :  { %839 = vmatmul.mubr.bf16.vlgmr.msra.gmra.mrb[0].mxu0 %v2927_v47 }
  0xa3   :  { %848 = vmatprep.mubr.bf16.mxu0 %v3133_v46  ;;  %2583 = vmatpush3.bf16.msra.mxu0 %v3052_v41 }
  0xa4   :  { %1463 = vmatpush1.bf16.msra.mxu1 %v2969_v62  ;;  %2584 = vmatprep.subr.bf16.mxu0 %v3055_v45  ;;  %v2987_v45 = vld [vmem:[%s4039_s3 + $0x124] ss:$8 sps:$4 sm:$0xff]  }
  0xa5   :  { %1464 = vmatprep.subr.bf16.mxu1 %v2970_v63 }
  0xa7   :  { %2585 = vmatpush3.bf16.msra.mxu0 %v3056_v55  ;;  %v2999_v55 = vld [vmem:[%s4039_s3 + $0x164] ss:$8 sps:$4 sm:$0xff]  }
  0xa8   :  { %1465 = vmatpush1.bf16.msra.mxu1 %v2972_v0 }
  0xa9   :  { %1466 = vmatprep.subr.bf16.mxu1 %v2973_v1 }
  0xaa   :  { %849 = vmatmul.mubr.bf16.gmra.mrb[4].mxu0 %v2928_v48 }
  0xab   :  { %858 = vmatprep.mubr.bf16.mxu0 %v3133_v46 }
  0xac   :  { %1467 = vmatpush1.bf16.msra.mxu1 %v2975_v2 }
  0xad   :  { %1468 = vmatprep.subr.bf16.mxu1 %v2976_v3 }
  0xb0   :  { %1469 = vmatpush1.bf16.msra.mxu1 %v2978_v4 }
  0xb1   :  { %1491 = vmatprep.subr.bf16.mxu1 %v2981_v5 }
  0xb2   :  { %859 = vmatmul.mubr.bf16.gmra.mrb[8].mxu0 %v2929_v49  ;;  %v3134_v49 = vmov 0.0  }
  0xb3   :  { %868 = vmatprep.mubr.bf16.mxu0 %v3133_v46  ;;  %v930_v54 = vrot.slane %v3134_v49, 2 }
  0xba   :  { %869 = vmatmul.mubr.bf16.gmra.mrb[12].mxu0 %v2930_v50  ;;  %v914_v50 = vrot.slane %v3134_v49, 1 }
 0x175   :  { %v840_v13 = vpop.f32.mrb[0].mxu0 }
 0x176   :  { %v2707_v14 = vadd.f32 %v840_v13, %v3609_v11  ;;  %v842_v15 = vpop.f32.mrb[1].mxu0 }
 0x177   :  { %v2708_v16 = vadd.f32 %v842_v15, %v3613_v12  ;;  %v844_v17 = vpop.f32.mrb[2].mxu0 }
 0x178   :  { %v879_v18 = vmax.f32 %v2707_v14, 0.0  ;;  %v2709_v19 = vadd.f32 %v844_v17, %v3609_v11  ;;  %v846_v20 = vpop.f32.mrb[3].mxu0 }
 0x179   :  { %v880_v21 = vmax.f32 %v2708_v16, 0.0  ;;  %v2710_v22 = vadd.f32 %v846_v20, %v3613_v12 }
 0x17a   :  { %v881_v23 = vmax.f32 %v2709_v19, 0.0 }
 0x17b   :  { %v895_v24 = vmax.f32 %v879_v18, %v880_v21  ;;  %v882_v25 = vmax.f32 %v2710_v22, 0.0 }
 0x17d   :  { %v896_v26 = vmax.f32 %v881_v23, %v882_v25  ;;  %v850_v27 = vpop.f32.mrb[4].mxu0 }
 0x17e   :  { %v2711_v28 = vadd.f32 %v850_v27, %v3609_v11  ;;  %v852_v29 = vpop.f32.mrb[5].mxu0 }
 0x17f   :  { %v2712_v30 = vadd.f32 %v852_v29, %v3613_v12  ;;  %v854_v31 = vpop.f32.mrb[6].mxu0 }
 0x180   :  { %v883_v32 = vmax.f32 %v2711_v28, 0.0  ;;  %v2713_v33 = vadd.f32 %v854_v31, %v3609_v11  ;;  %v856_v34 = vpop.f32.mrb[7].mxu0 }
 0x181   :  { %v884_v35 = vmax.f32 %v2712_v30, 0.0  ;;  %v2714_v36 = vadd.f32 %v856_v34, %v3613_v12 }
 0x182   :  { %v885_v37 = vmax.f32 %v2713_v33, 0.0 }
 0x183   :  { %v897_v38 = vmax.f32 %v883_v32, %v884_v35  ;;  %v886_v39 = vmax.f32 %v2714_v36, 0.0  ;;  %v2979_v35 = vld [vmem:[%s4039_s3 + $0x100] ss:$8 sps:$4 sm:$0xff]  }
 0x185   :  { %v3629_v42 = vmax.f32 %v895_v24, %v897_v38  ;;  %v898_v43 = vmax.f32 %v885_v37, %v886_v39  ;;  %v860_v44 = vpop.f32.mrb[8].mxu0 }
 0x186   :  { %v2715_v47 = vadd.f32 %v860_v44, %v3609_v11  ;;  %v862_v48 = vpop.f32.mrb[9].mxu0  ;;  %v2982_v44 = vld [vmem:[%s4039_s3 + $0x110] ss:$8 sps:$4 sm:$0xff]  }
 0x187   :  { %v904_v51 = vmax.f32 %v896_v26, %v898_v43  ;;  %v2716_v52 = vadd.f32 %v862_v48, %v3613_v12  ;;  %v864_v53 = vpop.f32.mrb[10].mxu0  ;;  %v911_v59 = vrot.slane %v3629_v42, 1  ;;  %v927_v1 = vrot.slane %v3629_v42, 2  ;;  %v2990_v48 = vld [vmem:[%s4039_s3 + $0x134] ss:$8 sps:$4 sm:$0xff]  }
 0x188   :  { %v887_v56 = vmax.f32 %v2715_v47, 0.0  ;;  %v2717_v57 = vadd.f32 %v864_v53, %v3609_v11  ;;  %v866_v58 = vpop.f32.mrb[11].mxu0  ;;  %v2985_v47 = vld [vmem:[%s4039_s3 + $0x120] ss:$8 sps:$4 sm:$0xff]   ;;  %v2996_v53 = vld [vmem:[%s4039_s3 + $0x154] ss:$8 sps:$4 sm:$0xff]  }
 0x189   :  { %v888_v60 = vmax.f32 %v2716_v52, 0.0  ;;  %v2718_v61 = vadd.f32 %v866_v58, %v3613_v12  ;;  %v940_v62 = vpack.c.bf16 %v904_v51, %v3629_v42  ;;  %v912_v63 = vrot.slane %v904_v51, 1  ;;  %v2991_v52 = vld [vmem:[%s4039_s3 + $0x140] ss:$8 sps:$4 sm:$0xff]   ;;  %v3000_v58 = vld [vmem:[%s4039_s3 + $0x170] ss:$8 sps:$4 sm:$0xff]  }
 0x18a   :  { %v889_v0 = vmax.f32 %v2717_v57, 0.0  ;;  %v928_v2 = vrot.slane %v904_v51, 2  ;;  %v2993_v51 = vld [vmem:[%s4039_s3 + $0x144] ss:$8 sps:$4 sm:$0xff]   ;;  %v3002_v57 = vld [vmem:[%s4039_s3 + $0x174] ss:$8 sps:$4 sm:$0xff]  }
 0x18b   :  { %v899_v3 = vmax.f32 %v887_v56, %v888_v60  ;;  %v890_v4 = vmax.f32 %v2718_v61, 0.0  ;;  %v913_v5 = vsel %vm910_vm0, %v911_v59, %v912_v63  ;;  %v915_v6 = vsel %vm910_vm0, %v912_v63, %v914_v50  ;;  %v2997_v56 = vld [vmem:[%s4039_s3 + $0x160] ss:$8 sps:$4 sm:$0xff]   ;;  %v3005_v59 = vld [vmem:[%s4039_s3 + $0x184] ss:$8 sps:$4 sm:$0xff]  }
 0x18c   :  { %v3648_v9 = vpack.c.bf16 %v915_v6, %v913_v5  ;;  %v929_v13 = vsel %vm926_vm1, %v927_v1, %v928_v2  ;;  %v931_v14 = vsel %vm926_vm1, %v928_v2, %v930_v54  ;;  %v3003_v60 = vld [vmem:[%s4039_s3 + $0x180] ss:$8 sps:$4 sm:$0xff]   ;;  %v3008_v61 = vld [vmem:[%s4039_s3 + $0x194] ss:$8 sps:$4 sm:$0xff]   ;;  %v3011_v63 = vld [vmem:[%s4039_s3 + $0x1a4] ss:$8 sps:$4 sm:$0xff]  }
 0x18d   :  { %v900_v15 = vmax.f32 %v889_v0, %v890_v4  ;;  %v870_v16 = vpop.f32.mrb[12].mxu0  ;;  %v3652_v17 = vpack.c.bf16 %v931_v14, %v929_v13  ;;  %v3009_v0 = vld [vmem:[%s4039_s3 + $0x1a0] ss:$8 sps:$4 sm:$0xff]   ;;  %v3014_v1 = vld [vmem:[%s4039_s3 + $0x1b4] ss:$8 sps:$4 sm:$0xff]  }
 0x18e   :  { %v2719_v18 = vadd.f32 %v870_v16, %v3609_v11  ;;  %v872_v19 = vpop.f32.mrb[13].mxu0  ;;  %v3012_v2 = vld [vmem:[%s4039_s3 + $0x1b0] ss:$8 sps:$4 sm:$0xff]   ;;  %v3015_v4 = vld [vmem:[%s4039_s3 + $0x1c0] ss:$8 sps:$4 sm:$0xff]  }
 0x18f   :  { %v2720_v20 = vadd.f32 %v872_v19, %v3613_v12  ;;  %v874_v21 = vpop.f32.mrb[14].mxu0  ;;  %v3020_v5 = vld [vmem:[%s4039_s3 + $0x1d4] ss:$8 sps:$4 sm:$0xff]   ;;  %v3018_v6 = vld [vmem:[%s4039_s3 + $0x1d0] ss:$8 sps:$4 sm:$0xff]  }
 0x190   :  { %v891_v22 = vmax.f32 %v2719_v18, 0.0  ;;  %v2721_v23 = vadd.f32 %v874_v21, %v3609_v11  ;;  %v876_v24 = vpop.f32.mrb[15].mxu0  ;;  %v2984_v11 = vld [vmem:[%s4039_s3 + $0x114] ss:$8 sps:$4 sm:$0xff]   ;;  %v3023_v13 = vld [vmem:[%s4039_s3 + $0x1e4] ss:$8 sps:$4 sm:$0xff]  }
 0x191   :  { %v892_v25 = vmax.f32 %v2720_v20, 0.0  ;;  %v2722_v26 = vadd.f32 %v876_v24, %v3613_v12  ;;  %v3021_v14 = vld [vmem:[%s4039_s3 + $0x1e0] ss:$8 sps:$4 sm:$0xff]   ;;  %v3024_v16 = vld [vmem:[%s4039_s3 + $0x1f0] ss:$8 sps:$4 sm:$0xff]  }
 0x192   :  { %v893_v27 = vmax.f32 %v2721_v23, 0.0  ;;  %v3029_v18 = vld [vmem:[%s4039_s3 + $0x204] ss:$8 sps:$4 sm:$0xff]   ;;  %v3027_v19 = vld [vmem:[%s4039_s3 + $0x200] ss:$8 sps:$4 sm:$0xff]  }
 0x193   :  { %v901_v28 = vmax.f32 %v891_v22, %v892_v25  ;;  %v894_v29 = vmax.f32 %v2722_v26, 0.0  ;;  %v3032_v20 = vld [vmem:[%s4039_s3 + $0x214] ss:$8 sps:$4 sm:$0xff]   ;;  %v3030_v21 = vld [vmem:[%s4039_s3 + $0x210] ss:$8 sps:$4 sm:$0xff]  }
 0x194   :  { %v3035_v22 = vld [vmem:[%s4039_s3 + $0x224] ss:$8 sps:$4 sm:$0xff]   ;;  %v3033_v23 = vld [vmem:[%s4039_s3 + $0x220] ss:$8 sps:$4 sm:$0xff]   ;;  %v3036_v24 = vld [vmem:[%s4039_s3 + $0x230] ss:$8 sps:$4 sm:$0xff]  }
 0x195   :  { %v905_v30 = vmax.f32 %v899_v3, %v901_v28  ;;  %v902_v31 = vmax.f32 %v893_v27, %v894_v29  ;;  %v3017_v3 = vld [vmem:[%s4039_s3 + $0x1c4] ss:$8 sps:$4 sm:$0xff]   ;;  %v3039_v26 = vld [vmem:[%s4039_s3 + $0x240] ss:$8 sps:$4 sm:$0xff]   ;;  %v3044_v27 = vld [vmem:[%s4039_s3 + $0x254] ss:$8 sps:$4 sm:$0xff]  }
 0x196   :  { %v3041_v25 = vld [vmem:[%s4039_s3 + $0x244] ss:$8 sps:$4 sm:$0xff]   ;;  %v3042_v28 = vld [vmem:[%s4039_s3 + $0x250] ss:$8 sps:$4 sm:$0xff]  }
 0x197   :  { %v906_v32 = vmax.f32 %v900_v15, %v902_v31  ;;  %v920_v33 = vrot.slane %v905_v30, 1  ;;  %v934_v37 = vrot.slane %v905_v30, 2  ;;  %v3026_v15 = vld [vmem:[%s4039_s3 + $0x1f4] ss:$8 sps:$4 sm:$0xff]   ;;  %v3047_v29 = vld [vmem:[%s4039_s3 + $0x264] ss:$8 sps:$4 sm:$0xff]  }
 0x198   :  { %v3050_v31 = vld [vmem:[%s4039_s3 + $0x274] ss:$8 sps:$4 sm:$0xff]  }
 0x199   :  { %v941_v34 = vpack.c.bf16 %v906_v32, %v905_v30  ;;  %v921_v36 = vrot.slane %v906_v32, 1  ;;  %v935_v38 = vrot.slane %v906_v32, 2  ;;  %v3045_v30 = vld [vmem:[%s4039_s3 + $0x260] ss:$8 sps:$4 sm:$0xff]   ;;  %v3048_v32 = vld [vmem:[%s4039_s3 + $0x270] ss:$8 sps:$4 sm:$0xff]  }
 0x19b   :  { %1470 = vmatprep.mubr.bf16.mxu1 %v941_v34  ;;  %v922_v12 = vsel %vm910_vm0, %v920_v33, %v921_v36  ;;  %v923_v39 = vsel %vm910_vm0, %v921_v36, %v914_v50  ;;  %v3667_v40 = vsel %vm926_vm1, %v934_v37, %v935_v38  ;;  %v3670_v41 = vsel %vm926_vm1, %v935_v38, %v930_v54  ;;  %v2988_v50 = vld [vmem:[%s4039_s3 + $0x130] ss:$8 sps:$4 sm:$0xff]   ;;  %v3053_v33 = vld [vmem:[%s4041_s5 + $0xc0] sm:$0xff]   ;;  %v3058_v36 = vld [vmem:[%s4041_s5 + $0x88] sm:$0xff]  }
 0x19c   :  { %1471 = vmatmul.mubr.bf16.vlgmr.msra.gmra.mrb[0].mxu1 %v940_v62  ;;  %v3672_v42 = vpack.c.bf16 %v923_v39, %v922_v12  ;;  %v945_v43 = vpack.c.bf16 %v3670_v41, %v3667_v40  ;;  %v2994_v54 = vld [vmem:[%s4039_s3 + $0x150] ss:$8 sps:$4 sm:$0xff]   ;;  %v3067_v41 = vld [vmem:[%s4041_s5 + $0x60] sm:$0xff]  }
 0x19d   :  { %1492 = vmatpush1.bf16.msra.mxu1 %v2979_v35  ;;  %1480 = vmatprep.mubr.bf16.mxu1 %v3648_v9  ;;  %v3006_v62 = vld [vmem:[%s4039_s3 + $0x190] ss:$8 sps:$4 sm:$0xff]   ;;  %v3057_v35 = vld [vmem:[%s4041_s5 + $0xc8] sm:$0xff]  }
 0x19e   :  { %1493 = vmatprep.subr.bf16.mxu1 %v2984_v11  ;;  %v3059_v37 = vld [vmem:[%s4041_s5 + $0x50] sm:$0xff]   ;;  %v3063_v11 = vld [vmem:[%s4041_s5 + $0x58] sm:$0xff]  }
 0x19f   :  { %2586 = vmatprep.subr.bf16.mxu0 %v3059_v37  ;;  %v3062_v38 = vld [vmem:[%s4041_s5 + $0x90] sm:$0xff]   ;;  %v3064_v12 = vld [vmem:[%s4041_s5 + $0x18] sm:$0xff]  }
 0x1a0   :  { %v3065_v39 = vld [vmem:[%s4041_s5 + $0xd8] sm:$0xff]  }
 0x1a1   :  { %1494 = vmatpush1.bf16.msra.mxu1 %v2982_v44  ;;  %v3066_v40 = vld [vmem:[%s4041_s5 + $0x98] sm:$0xff]   ;;  %v3070_v44 = vld [vmem:[%s4041_s5 + $0xa0] sm:$0xff]  }
 0x1a2   :  { %1495 = vmatprep.subr.bf16.mxu1 %v2987_v45  ;;  %v3071_v45 = vld [vmem:[%s4041_s5 + $0x68] sm:$0xff]  }
 0x1a4   :  { %1481 = vmatmul.mubr.bf16.gmra.mrb[4].mxu1 %v941_v34  ;;  %v3054_v34 = vld [vmem:[%s4041_s5 + $0x80] sm:$0xff]  }
 0x1a5   :  { %1496 = vmatpush1.bf16.msra.mxu1 %v2985_v47  ;;  %1523 = vmatprep.mubr.bf16.mxu1 %v3672_v42  ;;  %v3072_v47 = vld [vmem:[%s4041_s5 + $0x28] sm:$0xff]  }
 0x1a6   :  { %1497 = vmatprep.subr.bf16.mxu1 %v2990_v48  ;;  %v3073_v48 = vld [vmem:[%s4041_s5 + $0xe8] sm:$0xff]  }
 0x1a9   :  { %1498 = vmatpush1.bf16.msra.mxu1 %v2988_v50  ;;  %v3074_v50 = vld [vmem:[%s4041_s5 + $0xa8] sm:$0xff]  }
 0x1aa   :  { %1499 = vmatprep.subr.bf16.mxu1 %v2993_v51  ;;  %v3075_v51 = vld [vmem:[%s4041_s5 + $0x70] sm:$0xff]  }
 0x1ad   :  { %1500 = vmatpush1.bf16.msra.mxu1 %v2991_v52  ;;  %v3076_v52 = vld [vmem:[%s4041_s5 + $0x30] sm:$0xff]  }
 0x1ae   :  { %1501 = vmatprep.subr.bf16.mxu1 %v2996_v53  ;;  %v3077_v53 = vld [vmem:[%s4041_s5 + $0xf0] sm:$0xff]  }
 0x1b1   :  { %1502 = vmatpush1.bf16.msra.mxu1 %v2994_v54  ;;  %v3078_v54 = vld [vmem:[%s4041_s5 + $0xb0] sm:$0xff]  }
 0x1b2   :  { %1503 = vmatprep.subr.bf16.mxu1 %v2999_v55  ;;  %v3079_v55 = vld [vmem:[%s4041_s5 + $0x78] sm:$0xff]  }
 0x1b5   :  { %1504 = vmatpush1.bf16.msra.mxu1 %v2997_v56  ;;  %v3080_v56 = vld [vmem:[%s4041_s5 + $0x38] sm:$0xff]  }
 0x1b6   :  { %1505 = vmatprep.subr.bf16.mxu1 %v3002_v57  ;;  %v3081_v57 = vld [vmem:[%s4041_s5 + $0xf8] sm:$0xff]  }
 0x1b9   :  { %1506 = vmatpush1.bf16.msra.mxu1 %v3000_v58  ;;  %v3082_v58 = vld [vmem:[%s4041_s5 + $0xb8] sm:$0xff]  }
 0x1ba   :  { %1507 = vmatprep.subr.bf16.mxu1 %v3005_v59  ;;  %v1026_v59 = vld [vmem:[%s4040_s4] sm:$0x3] }
 0x1bd   :  { %1508 = vmatpush1.bf16.msra.mxu1 %v3003_v60  ;;  %v1031_v60 = vrot.slane %v1026_v59, %v148_v8 }
 0x1be   :  { %1509 = vmatprep.subr.bf16.mxu1 %v3008_v61  ;;  %v1035_v61 = vrot.slane %v1026_v59, %v152_v10  ;;  %v3095_v59 = vld [vmem:[%s4043_s7 + $0x20] sm:$0xff]  }
 0x1c1   :  { %1510 = vmatpush1.bf16.msra.mxu1 %v3006_v62 }
 0x1c2   :  { %1511 = vmatprep.subr.bf16.mxu1 %v3011_v63 }
 0x1c5   :  { %1512 = vmatpush1.bf16.msra.mxu1 %v3009_v0 }
 0x1c6   :  { %1513 = vmatprep.subr.bf16.mxu1 %v3014_v1 }
 0x1c9   :  { %1514 = vmatpush1.bf16.msra.mxu1 %v3012_v2 }
 0x1ca   :  { %1515 = vmatprep.subr.bf16.mxu1 %v3017_v3 }
 0x1cd   :  { %1516 = vmatpush1.bf16.msra.mxu1 %v3015_v4 }
 0x1ce   :  { %1517 = vmatprep.subr.bf16.mxu1 %v3020_v5 }
 0x1d1   :  { %1518 = vmatpush1.bf16.msra.mxu1 %v3018_v6 }
 0x1d2   :  { %1519 = vmatprep.subr.bf16.mxu1 %v3023_v13 }
 0x1d5   :  { %1520 = vmatpush1.bf16.msra.mxu1 %v3021_v14 }
 0x1d6   :  { %1521 = vmatprep.subr.bf16.mxu1 %v3026_v15 }
 0x1d9   :  { %1522 = vmatpush1.bf16.msra.mxu1 %v3024_v16 }
 0x1da   :  { %1544 = vmatprep.subr.bf16.mxu1 %v3029_v18 }
 0x1dc   :  { %1524 = vmatmul.mubr.bf16.vlgmr.msra.gmra.mrb[0].mxu1 %v3648_v9  ;;  %v3038_v9 = vld [vmem:[%s4039_s3 + $0x234] ss:$8 sps:$4 sm:$0xff]  }
 0x1dd   :  { %1533 = vmatprep.mubr.bf16.mxu1 %v3652_v17  ;;  %1545 = vmatpush1.bf16.msra.mxu1 %v3027_v19 }
 0x1de   :  { %1546 = vmatprep.subr.bf16.mxu1 %v3032_v20 }
 0x1e1   :  { %1547 = vmatpush1.bf16.msra.mxu1 %v3030_v21 }
 0x1e2   :  { %1548 = vmatprep.subr.bf16.mxu1 %v3035_v22 }
 0x1e4   :  { %1534 = vmatmul.mubr.bf16.gmra.mrb[4].mxu1 %v3672_v42  ;;  %v3068_v42 = vld [vmem:[%s4041_s5 + $0x20] sm:$0xff]  }
 0x1e5   :  { %1549 = vmatpush1.bf16.msra.mxu1 %v3033_v23  ;;  %1576 = vmatprep.mubr.bf16.mxu1 %v3133_v46 }
 0x1e6   :  { %1550 = vmatprep.subr.bf16.mxu1 %v3038_v9 }
 0x1e9   :  { %1551 = vmatpush1.bf16.msra.mxu1 %v3036_v24 }
 0x1ea   :  { %1552 = vmatprep.subr.bf16.mxu1 %v3041_v25 }
 0x1ed   :  { %1553 = vmatpush1.bf16.msra.mxu1 %v3039_v26 }
 0x1ee   :  { %1554 = vmatprep.subr.bf16.mxu1 %v3044_v27 }
 0x1f1   :  { %1555 = vmatpush1.bf16.msra.mxu1 %v3042_v28 }
 0x1f2   :  { %1556 = vmatprep.subr.bf16.mxu1 %v3047_v29 }
 0x1f5   :  { %1557 = vmatpush1.bf16.msra.mxu1 %v3045_v30 }
 0x1f6   :  { %1558 = vmatprep.subr.bf16.mxu1 %v3050_v31 }
 0x1f9   :  { %1559 = vmatpush1.bf16.msra.mxu1 %v3048_v32 }
 0x1fa   :  { %2604 = vmatprep.subr.bf16.mxu1 %v3053_v33 }
 0x1fc   :  { %1577 = vmatmul.mubr.bf16.vlgmr.msra.gmra.mrb[0].mxu1 %v3652_v17  ;;  %v3060_v17 = vld [vmem:[%s4041_s5 + $0x10] sm:$0xff]  }
 0x1fd   :  { %1586 = vmatprep.mubr.bf16.mxu1 %v3133_v46  ;;  %2605 = vmatpush3.bf16.msra.mxu1 %v3054_v34  ;;  %v3061_v46 = vld [vmem:[%s4041_s5 + $0xd0] sm:$0xff]  }
 0x1fe   :  { %2606 = vmatprep.subr.bf16.mxu1 %v3057_v35  ;;  %2587 = vmatpush3.bf16.msra.mxu0 %v3060_v17 }
 0x1ff   :  { %2588 = vmatprep.subr.bf16.mxu0 %v3063_v11 }
 0x201   :  { %2607 = vmatpush3.bf16.msra.mxu1 %v3058_v36 }
 0x202   :  { %2608 = vmatprep.subr.bf16.mxu1 %v3061_v46  ;;  %2589 = vmatpush3.bf16.msra.mxu0 %v3064_v12 }
 0x203   :  { %2590 = vmatprep.subr.bf16.mxu0 %v3067_v41 }
 0x204   :  { %1587 = vmatmul.mubr.bf16.gmra.mrb[4].mxu1 %v945_v43  ;;  %v3069_v43 = vld [vmem:[%s4041_s5 + $0xe0] sm:$0xff]  }
 0x205   :  { %2609 = vmatpush3.bf16.msra.mxu1 %v3062_v38 }
 0x206   :  { %2610 = vmatprep.subr.bf16.mxu1 %v3065_v39  ;;  %2591 = vmatpush3.bf16.msra.mxu0 %v3068_v42  ;;  %v3083_v39 = vld [vmem:[%s4041_s5 + $0x100] sm:$0xff]  }
 0x207   :  { %2592 = vmatprep.subr.bf16.mxu0 %v3071_v45  ;;  %v3084_v45 = vld [vmem:[%s4041_s5 + $0x108] sm:$0xff]  }
 0x209   :  { %2611 = vmatpush3.bf16.msra.mxu1 %v3066_v40 }
 0x20a   :  { %2612 = vmatprep.subr.bf16.mxu1 %v3069_v43  ;;  %2593 = vmatpush3.bf16.msra.mxu0 %v3072_v47  ;;  %v3085_v47 = vld [vmem:[%s4041_s5 + $0x110] sm:$0xff]  }
 0x20b   :  { %2594 = vmatprep.subr.bf16.mxu0 %v3075_v51  ;;  %v3088_v51 = vld [vmem:[%s4041_s5 + $0x128] sm:$0xff]  }
 0x20d   :  { %2613 = vmatpush3.bf16.msra.mxu1 %v3070_v44 }
 0x20e   :  { %2614 = vmatprep.subr.bf16.mxu1 %v3073_v48  ;;  %2595 = vmatpush3.bf16.msra.mxu0 %v3076_v52  ;;  %v3086_v48 = vld [vmem:[%s4041_s5 + $0x118] sm:$0xff]   ;;  %v3089_v52 = vld [vmem:[%s4041_s5 + $0x130] sm:$0xff]  }
 0x20f   :  { %2596 = vmatprep.subr.bf16.mxu0 %v3079_v55  ;;  %v3091_v55 = vld [vmem:[%s4043_s7] sm:$0xff]  }
 0x211   :  { %2615 = vmatpush3.bf16.msra.mxu1 %v3074_v50  ;;  %v3087_v50 = vld [vmem:[%s4041_s5 + $0x120] sm:$0xff]  }
 0x212   :  { %2616 = vmatprep.subr.bf16.mxu1 %v3077_v53  ;;  %2597 = vmatpush3.bf16.msra.mxu0 %v3080_v56  ;;  %v3090_v53 = vld [vmem:[%s4041_s5 + $0x138] sm:$0xff]   ;;  %v3092_v56 = vld [vmem:[%s4043_s7 + $0x8] sm:$0xff]  }
 0x213   :  { %2651 = vmatprep.subr.bf16.mxu0 %v3134_v49 }
 0x215   :  { %2617 = vmatpush3.bf16.msra.mxu1 %v3078_v54 }
 0x216   :  { %2618 = vmatprep.subr.bf16.mxu1 %v3081_v57  ;;  %v3093_v57 = vld [vmem:[%s4043_s7 + $0x10] sm:$0xff]  }
 0x219   :  { %2619 = vmatpush3.bf16.msra.mxu1 %v3082_v58  ;;  %v3094_v58 = vld [vmem:[%s4043_s7 + $0x18] sm:$0xff]  }
 0x21a   :  { %2671 = vmatprep.subr.bf16.mxu1 %v3134_v49 }
 0x2cf   :  { %v1578_v62 = vpop.f32.mrb[0].mxu1 }
 0x2d0   :  { %v2723_v63 = vadd.f32 %v1578_v62, %v1031_v60  ;;  %v1580_v0 = vpop.f32.mrb[1].mxu1  ;;  %v3098_v62 = vld [vmem:[%s4043_s7 + $0x38] ss:$0 sps:$4 sm:$0xff]  }
 0x2d1   :  { %v2724_v1 = vadd.f32 %v1580_v0, %v1035_v61  ;;  %v1582_v2 = vpop.f32.mrb[2].mxu1  ;;  %v3099_v0 = vld [vmem:[%s4045_s9] sm:$0xff]  }
 0x2d2   :  { %v1597_v3 = vmax.f32 %v2723_v63, 0.0  ;;  %v2725_v4 = vadd.f32 %v1582_v2, %v1031_v60  ;;  %v1584_v5 = vpop.f32.mrb[3].mxu1  ;;  %v2168_v63 = vsel %vm2166_vm4, %v3098_v62, 0  ;;  %v3101_v2 = vld [vmem:[%s4045_s9 + $0x10] sm:$0xff]  }
 0x2d3   :  { %v1598_v6 = vmax.f32 %v2724_v1, 0.0  ;;  %v2726_v13 = vadd.f32 %v1584_v5, %v1035_v61  ;;  %v3100_v1 = vld [vmem:[%s4045_s9 + $0x8] sm:$0xff]   ;;  %v2523_v5 = vld [vmem:[%s4042_s6] ss:$0 sm:$0xff] }
 0x2d4   :  { %v1599_v14 = vmax.f32 %v2725_v4, 0.0 }
 0x2d5   :  { %v1605_v15 = vmax.f32 %v1597_v3, %v1598_v6  ;;  %v1600_v16 = vmax.f32 %v2726_v13, 0.0  ;;  %v3102_v3 = vld [vmem:[%s4045_s9 + $0x18] sm:$0xff]  }
 0x2d7   :  { %v1606_v18 = vmax.f32 %v1599_v14, %v1600_v16  ;;  %v1588_v19 = vpop.f32.mrb[4].mxu1 }
 0x2d8   :  { %v2727_v20 = vadd.f32 %v1588_v19, %v1031_v60  ;;  %v1590_v8 = vpop.f32.mrb[5].mxu1 }
 0x2d9   :  { %v2728_v21 = vadd.f32 %v1590_v8, %v1035_v61  ;;  %v1592_v7 = vpop.f32.mrb[6].mxu1 }
 0x2da   :  { %v1601_v10 = vmax.f32 %v2727_v20, 0.0  ;;  %v2729_v22 = vadd.f32 %v1592_v7, %v1031_v60  ;;  %v1594_v23 = vpop.f32.mrb[7].mxu1  ;;  %v3096_v60 = vld [vmem:[%s4043_s7 + $0x28] sm:$0xff]  }
 0x2db   :  { %v1602_v9 = vmax.f32 %v2728_v21, 0.0  ;;  %v2730_v24 = vadd.f32 %v1594_v23, %v1035_v61  ;;  %v3097_v61 = vld [vmem:[%s4043_s7 + $0x30] sm:$0xff]  }
 0x2dc   :  { %v1603_v25 = vmax.f32 %v2729_v22, 0.0 }
 0x2dd   :  { %v1607_v26 = vmax.f32 %v1601_v10, %v1602_v9  ;;  %v1604_v27 = vmax.f32 %v2730_v24, 0.0 }
 0x2df   :  { %v1609_v28 = vmax.f32 %v1605_v15, %v1607_v26  ;;  %v1608_v29 = vmax.f32 %v1603_v25, %v1604_v27  ;;  %v3103_v27 = vld [vmem:[%s4045_s9 + $0x20] sm:$0xff]  }
 0x2e1   :  { %v1610_v30 = vmax.f32 %v1606_v18, %v1608_v29  ;;  %v1612_v31 = vrot.slane %v1609_v28, 1  ;;  %v1616_v32 = vrot.slane %v1609_v28, 3  ;;  %v1614_v33 = vrot.slane %v1609_v28, 2 }
 0x2e2   :  { %v1618_v46 = vrot.slane %v1609_v28, 4 }
 0x2e3   :  { %v1637_v34 = vsel %vm1635_vm2, %v1612_v31, %v1610_v30  ;;  %v1625_v35 = vrot.slane %v1610_v30, 7  ;;  %v2521_v36 = vrot.slane %v1610_v30, 10  ;;  %v2520_v37 = vrot.slane %v1610_v30, 9 }
 0x2e4   :  { %v1642_v17 = vpack.c.bf16 %v1637_v34, %v1637_v34  ;;  %v2522_v38 = vrot.slane %v1610_v30, 11  ;;  %v2564_v30 = vld [vmem:[%s4044_s8] ss:$0 sm:$0xff]  ;;  %s3136_s8 = smov [#allocation2]  }
 0x2e5   :  { %v1636_v11 = vsel %vm1635_vm2, %v1609_v28, %v1625_v35  ;;  %v1639_v12 = vsel %vm1635_vm2, %v1616_v32, %v2521_v36  ;;  %v1638_v40 = vsel %vm1635_vm2, %v1614_v33, %v2520_v37  ;;  %v3104_v28 = vld [vmem:[%s4045_s9 + $0x28] ss:$0 sps:$4 sm:$0x33]   ;;  %s2331_s9 = sshll.u32 %s3136_s8, 4  ;;  %s2332_s9 = int_to_ptr.vmem [resolvable:$true] %s2331_s9 }
 0x2e6   :  { %2005 = vmatprep.mubr.bf16.mxu0 %v1642_v17  ;;  %v1641_v41 = vpack.c.bf16 %v1636_v11, %v1636_v11  ;;  %v1644_v42 = vpack.c.bf16 %v1639_v12, %v1639_v12  ;;  %v1643_v43 = vpack.c.bf16 %v1638_v40, %v1638_v40  ;;  %v1640_v44 = vsel %vm1635_vm2, %v1618_v46, %v2522_v38  ;;  %p3114_p1 = scmp.lt.s32.totalorder %s2332_s9, %s2332_s9 }
 0x2e7   :  { %v1645_v54 = vpack.c.bf16 %v1640_v44, %v1640_v44  ;;  %v2269_v29 = vsel %vm2267_vm6, %v3104_v28, 0 }
 0x2e8   :  { %2006 = vmatmul.mubr.bf16.vlgmr.msra.gmra.mrb[16].mxu0 %v1641_v41  ;;  %2045 = vmatprep.mubr.bf16.mxu1 %v1644_v42 }
 0x2e9   :  { %2652 = vmatpush3.bf16.msra.mxu0 %v3083_v39  ;;  %2046 = vmatmul.mubr.bf16.vlgmr.msra.gmra.mrb[8].mxu1 %v1643_v43 }
 0x2ea   :  { %2653 = vmatprep.subr.bf16.mxu0 %v3134_v49  ;;  %2667 = vmatprep.mubr.msk.bf16.mxu0 %vm3135_vm3, %v3134_v49 }
 0x2eb   :  { %2687 = vmatprep.mubr.msk.bf16.mxu1 %vm3135_vm3, %v3134_v49  ;;  %2672 = vmatpush3.bf16.msra.mxu1 %v3091_v55 }
 0x2ec   :  { %2673 = vmatprep.subr.bf16.mxu1 %v3134_v49 }
 0x2ed   :  { %2654 = vmatpush3.bf16.msra.mxu0 %v3084_v45 }
 0x2ee   :  { %2655 = vmatprep.subr.bf16.mxu0 %v3134_v49 }
 0x2ef   :  { %2674 = vmatpush3.bf16.msra.mxu1 %v3092_v56 }
 0x2f0   :  { %2675 = vmatprep.subr.bf16.mxu1 %v3134_v49 }
 0x2f1   :  { %2656 = vmatpush3.bf16.msra.mxu0 %v3085_v47 }
 0x2f2   :  { %2657 = vmatprep.subr.bf16.mxu0 %v3134_v49 }
 0x2f3   :  { %2676 = vmatpush3.bf16.msra.mxu1 %v3093_v57 }
 0x2f4   :  { %2677 = vmatprep.subr.bf16.mxu1 %v3134_v49 }
 0x2f5   :  { %2658 = vmatpush3.bf16.msra.mxu0 %v3086_v48 }
 0x2f6   :  { %2659 = vmatprep.subr.bf16.mxu0 %v3134_v49 }
 0x2f7   :  { %2678 = vmatpush3.bf16.msra.mxu1 %v3094_v58 }
 0x2f8   :  { %2679 = vmatprep.subr.bf16.mxu1 %v3134_v49 }
 0x2f9   :  { %2660 = vmatpush3.bf16.msra.mxu0 %v3087_v50 }
 0x2fa   :  { %2661 = vmatprep.subr.bf16.mxu0 %v3134_v49 }
 0x2fb   :  { %2680 = vmatpush3.bf16.msra.mxu1 %v3095_v59 }
 0x2fc   :  { %2681 = vmatprep.subr.bf16.mxu1 %v3134_v49 }
 0x2fd   :  { %2662 = vmatpush3.bf16.msra.mxu0 %v3088_v51 }
 0x2fe   :  { %2663 = vmatprep.subr.bf16.mxu0 %v3134_v49 }
 0x2ff   :  { %2682 = vmatpush3.bf16.msra.mxu1 %v3096_v60 }
 0x300   :  { %2683 = vmatprep.subr.bf16.mxu1 %v3134_v49 }
 0x301   :  { %2664 = vmatpush3.bf16.msra.mxu0 %v3089_v52 }
 0x302   :  { %2665 = vmatprep.subr.bf16.mxu0 %v3134_v49 }
 0x303   :  { %2684 = vmatpush3.bf16.msra.mxu1 %v3097_v61 }
 0x304   :  { %2685 = vmatprep.subr.bf16.mxu1 %v3134_v49 }
 0x305   :  { %2666 = vmatpush3.bf16.msra.mxu0 %v3090_v53 }
 0x306   :  { %2691 = vmatprep.subr.bf16.mxu0 %v3134_v49 }
 0x307   :  { %2686 = vmatpush3.bf16.msra.mxu1 %v2168_v63 }
 0x308   :  { %2668 = vmatmul.mubr.bf16.vlgmr.msra.gmra.mrb[20].mxu0 %v1645_v54 }
 0x309   :  { %2703 = vmatprep.mubr.msk.bf16.mxu0 %vm3135_vm3, %v3134_v49  ;;  %2692 = vmatpush3.bf16.msra.mxu0 %v3099_v0 }
 0x30a   :  { %2693 = vmatprep.subr.bf16.mxu0 %v3134_v49 }
 0x30d   :  { %2694 = vmatpush3.bf16.msra.mxu0 %v3100_v1 }
 0x30e   :  { %2695 = vmatprep.subr.bf16.mxu0 %v3134_v49 }
 0x311   :  { %2696 = vmatpush3.bf16.msra.mxu0 %v3101_v2 }
 0x312   :  { %2697 = vmatprep.subr.bf16.mxu0 %v3134_v49 }
 0x315   :  { %2698 = vmatpush3.bf16.msra.mxu0 %v3102_v3 }
 0x316   :  { %2699 = vmatprep.subr.bf16.mxu0 %v3134_v49 }
 0x319   :  { %2700 = vmatpush3.bf16.msra.mxu0 %v3103_v27 }
 0x31a   :  { %2701 = vmatprep.subr.bf16.mxu0 %v3134_v49  ;;  %v2574_v49 = vld [vmem:[%s4046_s10] ss:$0 sm:$0xff]  ;;  %s3109_s10 = scalar_lea.vmem %s2332_s9, 32 }
 0x31b   :  { %p3110_p0 = scmp.ne.s32.totalorder %s2332_s9, %s3109_s10  ;;  %p3115_p2 = scmp.lt.s32.totalorder %s3109_s10, %s3109_s10 }
 0x31d   :  { %2702 = vmatpush3.bf16.msra.mxu0 %v2269_v29  ;;  %p3116_p3 = por %p3115_p2, %p3114_p1 }
 0x31f   :  { %p3117_p4 = pnand %p3116_p3, %p3110_p0 }
 0x3bb   :  { %v2598_v4 = vpop.f32.mrb[16].mxu0 }
 0x3bc   :  { %v2599_v6 = vpop.f32.mrb[17].mxu0  ;;  %v2620_v13 = vpop.f32.mrb[8].mxu1 }
 0x3bd   :  { %v2600_v14 = vadd.f32 %v2599_v6, %v2598_v4  ;;  %v2601_v15 = vpop.f32.mrb[18].mxu0  ;;  %v2621_v16 = vpop.f32.mrb[9].mxu1 }
 0x3be   :  { %v2622_v18 = vadd.f32 %v2621_v16, %v2620_v13  ;;  %v2602_v19 = vpop.f32.mrb[19].mxu0  ;;  %v2623_v20 = vpop.f32.mrb[10].mxu1 }
 0x3bf   :  { %v2008_v8 = vadd.f32 %v2600_v14, %v2523_v5  ;;  %v2624_v21 = vpop.f32.mrb[11].mxu1 }
 0x3c1   :  { %v2048_v7 = vadd.f32 %v2622_v18, %v2008_v8 }
 0x3db   :  { %v2087_v10 = vpop.f32.mrb[20].mxu0 }
 0x3dc   :  { %v2088_v22 = vadd.f32 %v2087_v10, %v2048_v7  ;;  %v2669_v23 = vpop.f32.mrb[21].mxu0 }
 0x3dd   :  { %v2090_v9 = vpop.f32.mrb[22].mxu0 }
 0x3de   :  { %v2093_v24 = vmax.f32 %v2088_v22, 0.0  ;;  %v2670_v25 = vpop.f32.mrb[23].mxu0 }
 0x3e0   :  { %v2094_v26 = vpack.c.bf16 %v2093_v24, %v2093_v24 }
 0x3e2   :  { %2688 = vmatmul.mubr.msk.bf16.vlgmr.msra.gmra.mrb[12].mxu1 %vm2162_vm5, %v2094_v26 }
 0x4b5   :  { %v2204_v31 = vpop.f32.mrb[12].mxu1 }
 0x4b6   :  { %v2205_v32 = vadd.f32 %v2564_v30, %v2204_v31  ;;  %v2689_v33 = vpop.f32.mrb[13].mxu1 }
 0x4b7   :  { %v2207_v34 = vpop.f32.mrb[14].mxu1 }
 0x4b8   :  { %v2210_v35 = vmax.f32 %v2205_v32, 0.0  ;;  %v2690_v36 = vpop.f32.mrb[15].mxu1 }
 0x4ba   :  { %v2211_v37 = vpack.c.bf16 %v2210_v35, %v2210_v35 }
 0x4bc   :  { %2704 = vmatmul.mubr.msk.bf16.vlgmr.msra.gmra.mrb[24].mxu0 %vm2263_vm7, %v2211_v37 }
 0x58f   :  { %v2305_v17 = vpop.f32.mrb[24].mxu0 }
 0x590   :  { %v2306_v46 = vadd.f32 %v2574_v49, %v2305_v17  ;;  %v2705_v38 = vpop.f32.mrb[25].mxu0 }
 0x591   :  { %v2308_v11 = vpop.f32.mrb[26].mxu0 }
 0x592   :  { %v2706_v12 = vpop.f32.mrb[27].mxu0  ;;  %v2312_v39 = vsel %vm2311_vm8, %v2306_v46, -inf }
 0x593   :  { %2313 = vmax.xlane.f32.xlu0 %v2312_v39 }
 0x620   :  { %v2314_v40 = vpop.xlane.xlu0 %2313 }
 0x621   :  { %v2315_v41 = vsub.f32 %v2306_v46, %v2314_v40 }
 0x623   :  { %v2316_v42 = vmul.f32 1.442695, %v2315_v41 }
 0x625   :  { %3105 = vpow2.f32 %v2316_v42 }
 0x62f   :  { %v3106_v43 = vpop.eup %3105 }
 0x630   :  { %v2318_v44 = vsel %vm2311_vm8, %v3106_v43, 0.0 }
 0x631   :  { %2319 = vadd.xlane.f32.xlu0 %v2318_v44 }
 0x6be   :  { %v2320_v45 = vpop.xlane.xlu0 %2319 }
 0x6bf   :  { %3107 = vlog2.f32 %v2320_v45 }
 0x6c9   :  { %v3108_v47 = vpop.eup %3107 }
 0x6ca   :  { %v2322_v48 = vmul.f32 0.6931472, %v3108_v47 }
 0x6cc   :  { %v2323_v50 = vsub.f32 %v2315_v41, %v2322_v48 }
 0x6ce   :  { %2324 = vst.msk [vmem:[#allocation2] sm:$0x3] %vm2311_vm8, %v2323_v50 }
 0x6cf   :  { %3120 = shalt.err (!%p3117_p4)
}
 0x6d0   :  { %s3121_s4 = scalar_lea.hbm %s4047_s11, 32 }
 0x6d1   :  { %p3122_p5 = scmp.ne.s32.totalorder %s4047_s11, %s3121_s4  ;;  %p3125_p6 = scmp.lt.u32.totalorder %s3121_s4, %s4047_s11 }
 0x6d3   :  { %p3127_p7 = pnand %p3125_p6, %p3122_p5 }
 0x6d5   :  { %3130 = shalt.err (!%p3127_p7)
}
 0x6d6   :  { %2334 = dma.vmem_to_hbm [thread:$0]  %s2332_s9, 32, %s4047_s11, [#allocation3]  }
 0x6d7   :  { %3131 = dma.done.wait [#allocation3], 32  }
 0x6d8   :  { %3132 = vsyncadd [#allocation3], 4294967264 }
 0x6d9   :  { %2338 = vsyncpa [#allocation3], 1 }

</bundles_post_ra>
